<compile_context>
chip_gen: v7x
topology: tpu7x:2x2x1
jax: 0.10.0
libtpu: 0.0.40
codegen_flags: <defaults>
</compile_context>

<pallas_src>
import functools

import jax
import jax.numpy as jnp
from jax.experimental import pallas as pl
from jax.experimental.pallas import tpu as pltpu


_BUFFERED = getattr(pl, "Buffered", None)


def _spec(block_shape, index_map, *, single_buffer=False):
    """BlockSpec helper; single_buffer=True drops the second pipeline buffer."""
    if single_buffer and _BUFFERED is not None:
        try:
            return pl.BlockSpec(block_shape, index_map, pipeline_mode=_BUFFERED(1))
        except TypeError:  # older BlockSpec signature without pipeline_mode
            pass
    return pl.BlockSpec(block_shape, index_map)


# ---------------------------------------------------------------------------
# Pallas kernel: trunk (2x Linear+ReLU) + residual + final Linear + LayerNorm
# operating on one (i_tile * N, ...) slab of edges for one batch element.
# ---------------------------------------------------------------------------
def _edge_mlp_kernel(edge_ref, pi1_ref, pj1_ref, pif_ref, pjf_ref,
                     w_e_ref, w2_ref, b2_ref, wfh_ref, gamma_ref, beta_ref,
                     o_ref, *, e_out):
    ti, h_pad = pi1_ref.shape          # (i_tile, H_pad)
    n = pj1_ref.shape[0]               # N
    rows = ti * n
    e_pad = pif_ref.shape[-1]          # E_pad
    f32 = jnp.float32

    e = edge_ref[...]                  # (rows, C_edge), bf16

    # ---- fused edge-operand matmul (tiny K): layer-1 preact | residual term ----
    ew = jnp.dot(e, w_e_ref[...], preferred_element_type=f32)   # (rows, H_pad+E_pad)

    # ---- trunk layer 1: relu(edge@W1_e + (p@W1_i + b1)[i] + (p@W1_j)[j]) -------
    h = ew[:, :h_pad].reshape(ti, n, h_pad)
    h = h + pi1_ref[...].astype(f32)[:, None, :] + pj1_ref[...].astype(f32)[None, :, :]
    h = jnp.maximum(h.reshape(rows, h_pad), 0.0)

    # ---- trunk layer 2 ---------------------------------------------------------
    h = jnp.dot(h.astype(jnp.bfloat16), w2_ref[...], preferred_element_type=f32)
    h = jnp.maximum(h + b2_ref[...], 0.0)

    # ---- final_layer(trunk(x) + x), residual split algebraically ---------------
    y = jnp.dot(h.astype(jnp.bfloat16), wfh_ref[...], preferred_element_type=f32)
    y = y + ew[:, h_pad:]
    y = y.reshape(ti, n, e_pad)
    y = y + pif_ref[...].astype(f32)[:, None, :] + pjf_ref[...].astype(f32)[None, :, :]
    y = y.reshape(rows, e_pad)

    # ---- LayerNorm over the first e_out lanes -----------------------------------
    # Padded lanes of y are exactly 0 (all padded weight/bias columns are 0), so
    # mean/E[y^2] over E_pad lanes divided by e_out are exact -> no iota/mask.
    inv_e = 1.0 / e_out
    mu = jnp.sum(y, axis=-1, keepdims=True) * inv_e
    ms = jnp.sum(y * y, axis=-1, keepdims=True) * inv_e
    var = jnp.maximum(ms - mu * mu, 0.0)
    yn = (y - mu) * jax.lax.rsqrt(var + 1e-5)
    o_ref[...] = (yn * gamma_ref[...] + beta_ref[...]).astype(o_ref.dtype)


# ---------------------------------------------------------------------------
# Helpers
# ---------------------------------------------------------------------------
def _round_up(x, m):
    return (x + m - 1) // m * m


def _tpu_vmem_capacity_bytes():
    try:
        return int(pltpu.get_tpu_info().vmem_capacity_bytes)
    except Exception:
        return 128 * 1024 * 1024      # v5e/v6e physical; safe upper default


def _choose_i_tile(n, b, per_row_bytes, budget_bytes, min_rows=512):
    """Pick i_tile (rows of i per grid step). Each step handles i_tile*N edges.

    Candidates are restricted so every derived block stays (8,128)-aligned:
      * i_tile divides N, and i_tile is a multiple of 8 or equals N,
      * i_tile*N (the edge/output block sublane extent) is a multiple of 8.
    When B is odd, an even inner grid extent is preferred (v7x 2-TC balance).
    """
    cands = [d for d in range(1, n + 1)
             if n % d == 0 and (d % 8 == 0 or d == n) and (d * n) % 8 == 0]
    if not cands:
        # TODO(synk): pad N (node/edge tensors) up to a multiple of 8 host-side.
        raise NotImplementedError("N does not admit an 8-aligned row tiling")
    fits = [d for d in cands if d * n * per_row_bytes <= budget_bytes] or cands[:1]
    good = [d for d in fits if d * n >= min_rows] or [fits[-1]]
    if b % 2 == 1:
        even = [d for d in good if (n // d) % 2 == 0]
        if even:
            return even[0]
    return good[0]


# ---------------------------------------------------------------------------
# Wrapper
# ---------------------------------------------------------------------------
def edge_transition_pallas(node_embed, edge_embed, params, *, i_tile=None,
                           out_dtype=jnp.bfloat16, vmem_limit_bytes=None,
                           return_padded=False):
    B, N, _ = node_embed.shape
    C_edge = edge_embed.shape[-1]
    Db = params["w_init"].shape[1]
    H = params["w1"].shape[0]
    E_out = params["wf"].shape[1]
    assert H == C_edge + 2 * Db

    # NOTE(v6e, speculative): if H_pad/E_pad land on odd multiples of 128, padding
    # to the next multiple of 256 may fill the 256-wide MXU better — measure first.
    H_pad = _round_up(H, 128)
    E_pad = _round_up(E_out, 128)

    f32, bf16 = jnp.float32, jnp.bfloat16

    def pad2(w, r, c):
        return jnp.pad(w.astype(f32), ((0, r - w.shape[0]), (0, c - w.shape[1])))

    def pad1(v, c):
        v = v.astype(f32).reshape(1, -1)
        return jnp.pad(v, ((0, 0), (0, c - v.shape[1])))

    w1, w2, wf = params["w1"], params["w2"], params["wf"]
    # Split the first/final weights along the input dim: x = [edge | p_i | p_j].
    w1_e = pad2(w1[:C_edge], C_edge, H_pad)
    w1_i = pad2(w1[C_edge:C_edge + Db], Db, H_pad)
    w1_j = pad2(w1[C_edge + Db:], Db, H_pad)
    wf_e = pad2(wf[:C_edge], C_edge, E_pad)
    wf_i = pad2(wf[C_edge:C_edge + Db], Db, E_pad)
    wf_j = pad2(wf[C_edge + Db:], Db, E_pad)
    # Fused edge-operand weight: one small-K matmul feeds both layer-1 and residual.
    w_e = jnp.concatenate([w1_e, wf_e], axis=1)        # (C_edge, H_pad + E_pad)
    w2_p = pad2(w2, H_pad, H_pad)
    wf_h = pad2(wf, H_pad, E_pad)
    b1 = pad1(params["b1"], H_pad)
    b2 = pad1(params["b2"], H_pad)
    bfin = pad1(params["bf"], E_pad)
    gamma = pad1(params["gamma"], E_pad)
    beta = pad1(params["beta"], E_pad)

    # Node-side projections: only B*N rows, stays in plain XLA (f32 compute).
    # b1/bf are folded in here; operands travel to the kernel in bf16.
    p = node_embed.astype(f32) @ params["w_init"].astype(f32) + params["b_init"].astype(f32)
    pi_h1 = (p @ w1_i + b1).astype(bf16)    # (B, N, H_pad) contribution of p[b, i] (+ b1)
    pj_h1 = (p @ w1_j).astype(bf16)         # (B, N, H_pad) contribution of p[b, j]
    pi_f = (p @ wf_i + bfin).astype(bf16)   # (B, N, E_pad) residual contribution of p[b, i] (+ bf)
    pj_f = (p @ wf_j).astype(bf16)          # (B, N, E_pad) residual contribution of p[b, j]

    # Edge features flattened to (B*N*N, C_edge) rows, bf16 for the MXU / HBM bytes.
    edge_flat = edge_embed.astype(bf16).reshape(B * N * N, C_edge)

    phys_vmem = _tpu_vmem_capacity_bytes()
    if vmem_limit_bytes is None:
        vmem_limit_bytes = phys_vmem * 3 // 4          # ~96 MiB v5e/v6e, ~48 MiB v7x
    out_itemsize = jnp.dtype(out_dtype).itemsize

    if i_tile is None:
        # Per-edge-row VMEM: lane-padded bf16 edge tile (x2 buffers), output tile
        # (x2 buffers), fused-matmul result, h(f32)+bf16 copy, y(f32)+bf16(h2) copy.
        C_lane = _round_up(C_edge, 128)
        per_row = (2 * 2 * C_lane
                   + 2 * E_pad * out_itemsize
                   + 4 * (H_pad + E_pad)
                   + (4 + 2) * H_pad
                   + 4 * E_pad + 2 * H_pad)
        wbuf = 1 if _BUFFERED is not None else 2       # single-buffered constants
        const_bytes = (wbuf * 2 * (C_edge * (H_pad + E_pad) + H_pad * H_pad + H_pad * E_pad)
                       + wbuf * 4 * 8 * (H_pad + 2 * E_pad)
                       + wbuf * 2 * _round_up(N, 8) * (H_pad + E_pad))
        budget = max(phys_vmem * 3 // 16 - const_bytes, 1 << 20)
        i_tile = _choose_i_tile(N, B, per_row, budget)
    assert N % i_tile == 0 and (i_tile % 8 == 0 or i_tile == N) and (i_tile * N) % 8 == 0
    n_it = N // i_tile
    rows_per_step = i_tile * N

    const2 = lambda b, it: (0, 0)
    row_map = lambda b, it: (b * n_it + it, 0)

    out = pl.pallas_call(
        functools.partial(_edge_mlp_kernel, e_out=E_out),
        out_shape=jax.ShapeDtypeStruct((B * N * N, E_pad), out_dtype),
        grid_spec=pltpu.PrefetchScalarGridSpec(
            num_scalar_prefetch=0,
            grid=(B, n_it),
            in_specs=[
                _spec((rows_per_step, C_edge), row_map),                           # edge rows (bf16)
                _spec((None, i_tile, H_pad), lambda b, it: (b, it, 0)),            # pi_h1 (bf16)
                _spec((None, N, H_pad), lambda b, it: (b, 0, 0),
                      single_buffer=True),                                         # pj_h1 (bf16)
                _spec((None, i_tile, E_pad), lambda b, it: (b, it, 0)),            # pi_f  (bf16)
                _spec((None, N, E_pad), lambda b, it: (b, 0, 0),
                      single_buffer=True),                                         # pj_f  (bf16)
                _spec((C_edge, H_pad + E_pad), const2, single_buffer=True),        # fused W1_e|Wf_e
                _spec((H_pad, H_pad), const2, single_buffer=True),                 # w2
                _spec((1, H_pad), const2, single_buffer=True),                     # b2
                _spec((H_pad, E_pad), const2, single_buffer=True),                 # wf_h
                _spec((1, E_pad), const2, single_buffer=True),                     # gamma
                _spec((1, E_pad), const2, single_buffer=True),                     # beta
            ],
            out_specs=pl.BlockSpec((rows_per_step, E_pad), row_map),               # lane-dense stores
        ),
        compiler_params=pltpu.CompilerParams(
            dimension_semantics=("parallel", "parallel"),
            vmem_limit_bytes=int(vmem_limit_bytes)),
    )(edge_flat, pi_h1, pj_h1, pi_f, pj_f,
      w_e.astype(bf16), w2_p.astype(bf16), b2,
      wf_h.astype(bf16), gamma, beta)

    if return_padded:
        return out.reshape(B, N, N, E_pad)
    if E_out != E_pad:
        # TODO(synk): hand the lane-padded (..., E_pad) layout to the consumer to
        # avoid this extra HBM pass over the output.
        out = out[:, :E_out]
    return out.reshape(B, N, N, E_out)


# ---------------------------------------------------------------------------
# Deterministic parameter init (same shapes as EdgeTransition.__init__;
# weights stored as (in, out), i.e. transposed w.r.t. torch's (out, in)).
# ---------------------------------------------------------------------------
def init_params(key, node_embed_size, edge_embed_in, edge_embed_out,
                node_dilation=2):
    Db = node_embed_size // node_dilation
    H = 2 * Db + edge_embed_in
    ks = jax.random.split(key, 4)

    def nrm(k, shape, scale):
        return jax.random.normal(k, shape, jnp.float32) * scale

    return {
        "w_init": nrm(ks[0], (node_embed_size, Db), (2.0 / node_embed_size) ** 0.5),
        "b_init": jnp.zeros((Db,), jnp.float32),
        "w1": nrm(ks[1], (H, H), (2.0 / H) ** 0.5),
        "b1": jnp.zeros((H,), jnp.float32),
        "w2": nrm(ks[2], (H, H), (2.0 / H) ** 0.5),
        "b2": jnp.zeros((H,), jnp.float32),
        # NOTE: the module's 'final' init is all-zeros (degenerate output);
        # use small deterministic random values so the test is non-trivial.
        "wf": nrm(ks[3], (H, edge_embed_out), 0.02),
        "bf": jnp.zeros((edge_embed_out,), jnp.float32),
        "gamma": jnp.ones((edge_embed_out,), jnp.float32),
        "beta": jnp.zeros((edge_embed_out,), jnp.float32),
    }


# ---------------------------------------------------------------------------
# Pure-JAX f32 reference (mirrors the PyTorch forward exactly)
# ---------------------------------------------------------------------------
def edge_transition_ref(node_embed, edge_embed, params):
    B, N, _ = node_embed.shape
    p = node_embed @ params["w_init"] + params["b_init"]
    Db = p.shape[-1]
    bias_i = jnp.broadcast_to(p[:, :, None, :], (B, N, N, Db))
    bias_j = jnp.broadcast_to(p[:, None, :, :], (B, N, N, Db))
    x = jnp.concatenate([edge_embed, bias_i, bias_j], axis=-1).reshape(B * N * N, -1)
    h = jax.nn.relu(x @ params["w1"] + params["b1"])
    h = jax.nn.relu(h @ params["w2"] + params["b2"])
    y = (h + x) @ params["wf"] + params["bf"]
    mu = y.mean(-1, keepdims=True)
    var = ((y - mu) ** 2).mean(-1, keepdims=True)
    y = (y - mu) / jnp.sqrt(var + 1e-5) * params["gamma"] + params["beta"]
    return y.reshape(B, N, N, -1)


if __name__ == "__main__":
    B, N = 2, 8
    node_embed_size, edge_embed_in, edge_embed_out = 32, 16, 32

    key = jax.random.PRNGKey(0)
    k_node, k_edge, k_param = jax.random.split(key, 3)
    node_embed = jax.random.normal(k_node, (B, N, node_embed_size), jnp.float32)
    edge_embed = jax.random.normal(k_edge, (B, N, N, edge_embed_in), jnp.float32)
    params = init_params(k_param, node_embed_size, edge_embed_in, edge_embed_out)

    out = jax.jit(edge_transition_pallas)(node_embed, edge_embed, params)
    out = jax.block_until_ready(out)

    ref = edge_transition_ref(node_embed, edge_embed, params)
    assert out.shape == (B, N, N, edge_embed_out)
    # bf16 MXU operands, bf16 node-side biases and bf16 output; LN/accum in f32.
    assert jnp.allclose(out.astype(jnp.float32), ref, atol=1e-1, rtol=5e-2), \
        float(jnp.max(jnp.abs(out.astype(jnp.float32) - ref)))
    print("KERNEL_OK")
</pallas_src>

<mosaic_0001>
module attributes {stable_mosaic.version = 11 : i64} {
  func.func @_edge_mlp_kernel(%arg0: i32, %arg1: i32, %arg2: memref<64x16xbf16, #tpu.memory_space<vmem>>, %arg3: memref<1x8x128xbf16, #tpu.memory_space<vmem>>, %arg4: memref<1x8x128xbf16, #tpu.memory_space<vmem>>, %arg5: memref<1x8x128xbf16, #tpu.memory_space<vmem>>, %arg6: memref<1x8x128xbf16, #tpu.memory_space<vmem>>, %arg7: memref<16x256xbf16, #tpu.memory_space<vmem>>, %arg8: memref<128x128xbf16, #tpu.memory_space<vmem>>, %arg9: memref<1x128xf32, #tpu.memory_space<vmem>>, %arg10: memref<128x128xbf16, #tpu.memory_space<vmem>>, %arg11: memref<1x128xf32, #tpu.memory_space<vmem>>, %arg12: memref<1x128xf32, #tpu.memory_space<vmem>>, %arg13: memref<64x128xbf16, #tpu.memory_space<vmem>>) attributes {dimension_semantics = [#tpu.dimension_semantics<parallel>, #tpu.dimension_semantics<parallel>], iteration_bounds = array<i64: 2, 1>, scalar_prefetch = 0 : i64, scratch_operands = 0 : i64, tpu.core_type = #tpu.core_type<tc>, window_params = [{transform_indices = @transform_0, window_bounds = array<i64: 64, 16>}, {transform_indices = @transform_1, window_bounds = array<i64: 1, 8, 128>}, {pipeline_mode = #tpu.pipeline_mode<synchronous>, transform_indices = @transform_2, window_bounds = array<i64: 1, 8, 128>}, {transform_indices = @transform_3, window_bounds = array<i64: 1, 8, 128>}, {pipeline_mode = #tpu.pipeline_mode<synchronous>, transform_indices = @transform_4, window_bounds = array<i64: 1, 8, 128>}, {pipeline_mode = #tpu.pipeline_mode<synchronous>, transform_indices = @transform_5, window_bounds = array<i64: 16, 256>}, {pipeline_mode = #tpu.pipeline_mode<synchronous>, transform_indices = @transform_6, window_bounds = array<i64: 128, 128>}, {pipeline_mode = #tpu.pipeline_mode<synchronous>, transform_indices = @transform_7, window_bounds = array<i64: 1, 128>}, {pipeline_mode = #tpu.pipeline_mode<synchronous>, transform_indices = @transform_8, window_bounds = array<i64: 128, 128>}, {pipeline_mode = #tpu.pipeline_mode<synchronous>, transform_indices = @transform_9, window_bounds = array<i64: 1, 128>}, {pipeline_mode = #tpu.pipeline_mode<synchronous>, transform_indices = @transform_10, window_bounds = array<i64: 1, 128>}, {transform_indices = @transform_11, window_bounds = array<i64: 64, 128>}]} {
    %c0 = arith.constant 0 : index
    %c0_0 = arith.constant 0 : index
    %0 = vector.load %arg2[%c0, %c0_0] : memref<64x16xbf16, #tpu.memory_space<vmem>>, vector<64x16xbf16>
    %c0_1 = arith.constant 0 : index
    %c0_2 = arith.constant 0 : index
    %1 = vector.load %arg7[%c0_1, %c0_2] : memref<16x256xbf16, #tpu.memory_space<vmem>>, vector<16x256xbf16>
    %cst = arith.constant dense<0.000000e+00> : vector<64x256xf32>
    %2 = tpu.matmul %0, %1, %cst {dimension_numbers = #tpu.dot_dimension_numbers<[1], [0], [0], [1], [0, 0, 1, 1], [], []>} : vector<64x16xbf16>, vector<16x256xbf16>, vector<64x256xf32> -> vector<64x256xf32>
    %3 = vector.extract_strided_slice %2 {offsets = [0, 0], sizes = [64, 128], strides = [1, 1]} : vector<64x256xf32> to vector<64x128xf32>
    %4 = vector.shape_cast %3 : vector<64x128xf32> to vector<8x8x128xf32>
    %c0_3 = arith.constant 0 : index
    %c0_4 = arith.constant 0 : index
    %c0_5 = arith.constant 0 : index
    %5 = vector.load %arg3[%c0_3, %c0_4, %c0_5] : memref<1x8x128xbf16, #tpu.memory_space<vmem>>, vector<1x8x128xbf16>
    %6 = vector.shape_cast %5 : vector<1x8x128xbf16> to vector<8x128xbf16>
    %7 = arith.extf %6 : vector<8x128xbf16> to vector<8x128xf32>
    %8 = vector.shape_cast %7 : vector<8x128xf32> to vector<8x1x128xf32>
    %9 = vector.broadcast %8 : vector<8x1x128xf32> to vector<8x8x128xf32>
    %10 = arith.addf %4, %9 : vector<8x8x128xf32>
    %c0_6 = arith.constant 0 : index
    %c0_7 = arith.constant 0 : index
    %c0_8 = arith.constant 0 : index
    %11 = vector.load %arg4[%c0_6, %c0_7, %c0_8] : memref<1x8x128xbf16, #tpu.memory_space<vmem>>, vector<1x8x128xbf16>
    %12 = vector.shape_cast %11 : vector<1x8x128xbf16> to vector<8x128xbf16>
    %13 = arith.extf %12 : vector<8x128xbf16> to vector<8x128xf32>
    %14 = vector.shape_cast %13 : vector<8x128xf32> to vector<1x8x128xf32>
    %15 = vector.broadcast %14 : vector<1x8x128xf32> to vector<8x8x128xf32>
    %16 = arith.addf %10, %15 : vector<8x8x128xf32>
    %17 = vector.shape_cast %16 : vector<8x8x128xf32> to vector<64x128xf32>
    %cst_9 = arith.constant 0.000000e+00 : f32
    %18 = vector.broadcast %cst_9 : f32 to vector<64x128xf32>
    %19 = arith.maximumf %17, %18 : vector<64x128xf32>
    %20 = arith.truncf %19 : vector<64x128xf32> to vector<64x128xbf16>
    %c0_10 = arith.constant 0 : index
    %c0_11 = arith.constant 0 : index
    %21 = vector.load %arg8[%c0_10, %c0_11] : memref<128x128xbf16, #tpu.memory_space<vmem>>, vector<128x128xbf16>
    %cst_12 = arith.constant dense<0.000000e+00> : vector<64x128xf32>
    %22 = tpu.matmul %20, %21, %cst_12 {dimension_numbers = #tpu.dot_dimension_numbers<[1], [0], [0], [1], [0, 0, 1, 1], [], []>} : vector<64x128xbf16>, vector<128x128xbf16>, vector<64x128xf32> -> vector<64x128xf32>
    %c0_13 = arith.constant 0 : index
    %c0_14 = arith.constant 0 : index
    %23 = vector.load %arg9[%c0_13, %c0_14] : memref<1x128xf32, #tpu.memory_space<vmem>>, vector<1x128xf32>
    %24 = vector.broadcast %23 : vector<1x128xf32> to vector<64x128xf32>
    %25 = arith.addf %22, %24 : vector<64x128xf32>
    %cst_15 = arith.constant 0.000000e+00 : f32
    %26 = vector.broadcast %cst_15 : f32 to vector<64x128xf32>
    %27 = arith.maximumf %25, %26 : vector<64x128xf32>
    %28 = arith.truncf %27 : vector<64x128xf32> to vector<64x128xbf16>
    %c0_16 = arith.constant 0 : index
    %c0_17 = arith.constant 0 : index
    %29 = vector.load %arg10[%c0_16, %c0_17] : memref<128x128xbf16, #tpu.memory_space<vmem>>, vector<128x128xbf16>
    %cst_18 = arith.constant dense<0.000000e+00> : vector<64x128xf32>
    %30 = tpu.matmul %28, %29, %cst_18 {dimension_numbers = #tpu.dot_dimension_numbers<[1], [0], [0], [1], [0, 0, 1, 1], [], []>} : vector<64x128xbf16>, vector<128x128xbf16>, vector<64x128xf32> -> vector<64x128xf32>
    %31 = vector.extract_strided_slice %2 {offsets = [0, 128], sizes = [64, 128], strides = [1, 1]} : vector<64x256xf32> to vector<64x128xf32>
    %32 = arith.addf %30, %31 : vector<64x128xf32>
    %33 = vector.shape_cast %32 : vector<64x128xf32> to vector<8x8x128xf32>
    %c0_19 = arith.constant 0 : index
    %c0_20 = arith.constant 0 : index
    %c0_21 = arith.constant 0 : index
    %34 = vector.load %arg5[%c0_19, %c0_20, %c0_21] : memref<1x8x128xbf16, #tpu.memory_space<vmem>>, vector<1x8x128xbf16>
    %35 = vector.shape_cast %34 : vector<1x8x128xbf16> to vector<8x128xbf16>
    %36 = arith.extf %35 : vector<8x128xbf16> to vector<8x128xf32>
    %37 = vector.shape_cast %36 : vector<8x128xf32> to vector<8x1x128xf32>
    %38 = vector.broadcast %37 : vector<8x1x128xf32> to vector<8x8x128xf32>
    %39 = arith.addf %33, %38 : vector<8x8x128xf32>
    %c0_22 = arith.constant 0 : index
    %c0_23 = arith.constant 0 : index
    %c0_24 = arith.constant 0 : index
    %40 = vector.load %arg6[%c0_22, %c0_23, %c0_24] : memref<1x8x128xbf16, #tpu.memory_space<vmem>>, vector<1x8x128xbf16>
    %41 = vector.shape_cast %40 : vector<1x8x128xbf16> to vector<8x128xbf16>
    %42 = arith.extf %41 : vector<8x128xbf16> to vector<8x128xf32>
    %43 = vector.shape_cast %42 : vector<8x128xf32> to vector<1x8x128xf32>
    %44 = vector.broadcast %43 : vector<1x8x128xf32> to vector<8x8x128xf32>
    %45 = arith.addf %39, %44 : vector<8x8x128xf32>
    %46 = vector.shape_cast %45 : vector<8x8x128xf32> to vector<64x128xf32>
    %cst_25 = arith.constant dense<0.000000e+00> : vector<64xf32>
    %47 = vector.multi_reduction <add>, %46, %cst_25 [1] : vector<64x128xf32> to vector<64xf32>
    %48 = vector.shape_cast %47 : vector<64xf32> to vector<64x1xf32>
    %cst_26 = arith.constant 3.125000e-02 : f32
    %49 = vector.broadcast %cst_26 : f32 to vector<64x1xf32>
    %50 = arith.mulf %48, %49 : vector<64x1xf32>
    %51 = arith.mulf %46, %46 : vector<64x128xf32>
    %cst_27 = arith.constant dense<0.000000e+00> : vector<64xf32>
    %52 = vector.multi_reduction <add>, %51, %cst_27 [1] : vector<64x128xf32> to vector<64xf32>
    %53 = vector.shape_cast %52 : vector<64xf32> to vector<64x1xf32>
    %cst_28 = arith.constant 3.125000e-02 : f32
    %54 = vector.broadcast %cst_28 : f32 to vector<64x1xf32>
    %55 = arith.mulf %53, %54 : vector<64x1xf32>
    %56 = arith.mulf %50, %50 : vector<64x1xf32>
    %57 = arith.subf %55, %56 : vector<64x1xf32>
    %cst_29 = arith.constant 0.000000e+00 : f32
    %58 = vector.broadcast %cst_29 : f32 to vector<64x1xf32>
    %59 = arith.maximumf %57, %58 : vector<64x1xf32>
    %60 = vector.broadcast %50 : vector<64x1xf32> to vector<64x128xf32>
    %61 = arith.subf %46, %60 : vector<64x128xf32>
    %cst_30 = arith.constant 9.99999974E-6 : f32
    %62 = vector.broadcast %cst_30 : f32 to vector<64x1xf32>
    %63 = arith.addf %59, %62 : vector<64x1xf32>
    %64 = math.rsqrt %63 : vector<64x1xf32>
    %65 = vector.broadcast %64 : vector<64x1xf32> to vector<64x128xf32>
    %66 = arith.mulf %61, %65 : vector<64x128xf32>
    %c0_31 = arith.constant 0 : index
    %c0_32 = arith.constant 0 : index
    %67 = vector.load %arg11[%c0_31, %c0_32] : memref<1x128xf32, #tpu.memory_space<vmem>>, vector<1x128xf32>
    %68 = vector.broadcast %67 : vector<1x128xf32> to vector<64x128xf32>
    %69 = arith.mulf %66, %68 : vector<64x128xf32>
    %c0_33 = arith.constant 0 : index
    %c0_34 = arith.constant 0 : index
    %70 = vector.load %arg12[%c0_33, %c0_34] : memref<1x128xf32, #tpu.memory_space<vmem>>, vector<1x128xf32>
    %71 = vector.broadcast %70 : vector<1x128xf32> to vector<64x128xf32>
    %72 = arith.addf %69, %71 : vector<64x128xf32>
    %73 = arith.truncf %72 : vector<64x128xf32> to vector<64x128xbf16>
    %c0_35 = arith.constant 0 : index
    %c0_36 = arith.constant 0 : index
    %74 = vector.load %arg13[%c0_35, %c0_36] : memref<64x128xbf16, #tpu.memory_space<vmem>>, vector<64x128xbf16>
    tpu.vector_store %arg13[%c0_35, %c0_36], %73 {strides = array<i32>} : memref<64x128xbf16, #tpu.memory_space<vmem>>, vector<64x128xbf16>,
    return
  }
  func.func @transform_0(%arg0: i32, %arg1: i32) -> (i32, i32) {
    %c1_i32 = arith.constant 1 : i32
    %0 = arith.muli %arg0, %c1_i32 : i32
    %1 = arith.addi %0, %arg1 : i32
    %c0_i32 = arith.constant 0 : i32
    %c0_i32_0 = arith.constant 0 : i32
    return %1, %c0_i32 : i32, i32
  }
  func.func @transform_1(%arg0: i32, %arg1: i32) -> (i32, i32, i32) {
    %c0_i32 = arith.constant 0 : i32
    %c0_i32_0 = arith.constant 0 : i32
    return %arg0, %arg1, %c0_i32 : i32, i32, i32
  }
  func.func @transform_2(%arg0: i32, %arg1: i32) -> (i32, i32, i32) {
    %c0_i32 = arith.constant 0 : i32
    %c0_i32_0 = arith.constant 0 : i32
    %c0_i32_1 = arith.constant 0 : i32
    return %arg0, %c0_i32, %c0_i32_0 : i32, i32, i32
  }
  func.func @transform_3(%arg0: i32, %arg1: i32) -> (i32, i32, i32) {
    %c0_i32 = arith.constant 0 : i32
    %c0_i32_0 = arith.constant 0 : i32
    return %arg0, %arg1, %c0_i32 : i32, i32, i32
  }
  func.func @transform_4(%arg0: i32, %arg1: i32) -> (i32, i32, i32) {
    %c0_i32 = arith.constant 0 : i32
    %c0_i32_0 = arith.constant 0 : i32
    %c0_i32_1 = arith.constant 0 : i32
    return %arg0, %c0_i32, %c0_i32_0 : i32, i32, i32
  }
  func.func @transform_5(%arg0: i32, %arg1: i32) -> (i32, i32) {
    %c0_i32 = arith.constant 0 : i32
    %c0_i32_0 = arith.constant 0 : i32
    %c0_i32_1 = arith.constant 0 : i32
    return %c0_i32, %c0_i32_0 : i32, i32
  }
  func.func @transform_6(%arg0: i32, %arg1: i32) -> (i32, i32) {
    %c0_i32 = arith.constant 0 : i32
    %c0_i32_0 = arith.constant 0 : i32
    %c0_i32_1 = arith.constant 0 : i32
    return %c0_i32, %c0_i32_0 : i32, i32
  }
  func.func @transform_7(%arg0: i32, %arg1: i32) -> (i32, i32) {
    %c0_i32 = arith.constant 0 : i32
    %c0_i32_0 = arith.constant 0 : i32
    %c0_i32_1 = arith.constant 0 : i32
    return %c0_i32, %c0_i32_0 : i32, i32
  }
  func.func @transform_8(%arg0: i32, %arg1: i32) -> (i32, i32) {
    %c0_i32 = arith.constant 0 : i32
    %c0_i32_0 = arith.constant 0 : i32
    %c0_i32_1 = arith.constant 0 : i32
    return %c0_i32, %c0_i32_0 : i32, i32
  }
  func.func @transform_9(%arg0: i32, %arg1: i32) -> (i32, i32) {
    %c0_i32 = arith.constant 0 : i32
    %c0_i32_0 = arith.constant 0 : i32
    %c0_i32_1 = arith.constant 0 : i32
    return %c0_i32, %c0_i32_0 : i32, i32
  }
  func.func @transform_10(%arg0: i32, %arg1: i32) -> (i32, i32) {
    %c0_i32 = arith.constant 0 : i32
    %c0_i32_0 = arith.constant 0 : i32
    %c0_i32_1 = arith.constant 0 : i32
    return %c0_i32, %c0_i32_0 : i32, i32
  }
  func.func @transform_11(%arg0: i32, %arg1: i32) -> (i32, i32) {
    %c1_i32 = arith.constant 1 : i32
    %0 = arith.muli %arg0, %c1_i32 : i32
    %1 = arith.addi %0, %arg1 : i32
    %c0_i32 = arith.constant 0 : i32
    %c0_i32_0 = arith.constant 0 : i32
    return %1, %c0_i32 : i32, i32
  }
}

</mosaic_0001>

<bundles_post_ra>
// kernel: edge_transition_pallas.1
= control target key start
LH: loop header
LB: loop body
LE: loop exit
PB: predicated region body
PF: predicated region fallthrough
CT: control target
= control target key end

     0   :  { %s3208_s0 = inlined_call_operand.hbm [shape: bf16[128,16], index: 0, kind: input, shape index: {}]   ;;  %s3209_s1 = inlined_call_operand.hbm [shape: bf16[2,8,128], index: 1, kind: input, shape index: {}]   ;;  %s3210_s2 = inlined_call_operand.hbm [shape: bf16[2,8,128], index: 2, kind: input, shape index: {}]   ;;  %s3211_s3 = inlined_call_operand.hbm [shape: bf16[2,8,128], index: 3, kind: input, shape index: {}]   ;;  %s3212_s4 = inlined_call_operand.hbm [shape: bf16[2,8,128], index: 4, kind: input, shape index: {}]   ;;  %s3213_s5 = inlined_call_operand.hbm [shape: bf16[16,256], index: 5, kind: input, shape index: {}]   ;;  %s3214_s6 = inlined_call_operand.hbm [shape: bf16[128,128], index: 6, kind: input, shape index: {}]   ;;  %s3215_s7 = inlined_call_operand.hbm [shape: f32[1,128], index: 7, kind: input, shape index: {}]   ;;  %s3216_s8 = inlined_call_operand.hbm [shape: bf16[128,128], index: 8, kind: input, shape index: {}]   ;;  %s3217_s9 = inlined_call_operand.hbm [shape: f32[1,128], index: 9, kind: input, shape index: {}]   ;;  %s3218_s10 = inlined_call_operand.hbm [shape: f32[1,128], index: 10, kind: input, shape index: {}]   ;;  %s3219_s11 = inlined_call_operand.hbm [shape: bf16[128,128], index: 11, kind: output, shape index: {}]  }
   0x1   :  { %3238 = sst [smem:[#allocation36_spill]] %s3210_s2 }
   0x2   :  { %3239 = sst [smem:[#allocation37_spill]] %s3212_s4 }
   0x3   :  { %3240 = sst [smem:[#allocation38_spill]] %s3213_s5 }
   0x4   :  { %3241 = sst [smem:[#allocation39_spill]] %s3215_s7 }
   0x5   :  { %3242 = sst [smem:[#allocation40_spill]] %s3219_s11 }
   0x6   :  { %16 = vsyncpa [#allocation3], 0 }
   0x7   :  { %18 = vsyncpa [#allocation3 + $0x1], 0 }
   0x8   :  { %19 = vsyncpa [#allocation6], 0 }
   0x9   :  { %21 = vsyncpa [#allocation6 + $0x1], 0 }
   0xa   :  { %22 = vsyncpa [#allocation9], 0 }
   0xb   :  { %24 = vsyncpa [#allocation9 + $0x1], 0 }
   0xc   :  { %25 = vsyncpa [#allocation12], 0 }
   0xd   :  { %26 = vsyncpa [#allocation15], 0 }
   0xe   :  { %27 = vsyncpa [#allocation18], 0 }
   0xf   :  { %28 = vsyncpa [#allocation4], 0 }
  0x10   :  { %30 = vsyncpa [#allocation4 + $0x1], 0  ;;  %s2547_s17 = smov 0   ;;  %s2549_s18 = smov 0  }
  0x11   :  { %s2551_s19 = smov 0   ;;  %s2553_s20 = smov 0  }
  0x12   :  { %s2555_s21 = smov 0   ;;  %s2557_s22 = smov 0  }
  0x13 LB: > { %3243 = sst [smem:[#allocation30_spill]] %s2445_s17  ;;  %s2578_s23 = sadd.s32 4294967295, %s2465_s22   ;;  %s2465_s22 = sphi %s2557_s22, %s36_s22   ;;  %s2461_s21 = sphi %s2555_s21, %s3294_s21   ;;  %s2457_s20 = sphi %s2553_s20, %s3293_s20   ;;  %s2453_s19 = sphi %s2551_s19, %s3292_s19   ;;  %s2449_s18 = sphi %s2549_s18, %s3291_s18   ;;  %s2445_s17 = sphi %s2547_s17, %s3290_s17  }
  0x14   : > { %3244 = sst [smem:[#allocation31_spill]] %s2457_s20  ;;  %s1669_s24 = sadd.s32 4294967294, %s2465_s22  }
  0x15   : > { %3245 = sst [smem:[#allocation32_spill]] %s2578_s23  ;;  %p64_p0 = scmp.ne.s32.totalorder %s2453_s19, %s2449_s18 }
  0x16   : > { %p65_p1 = scmp.eq.s32.totalorder %s2465_s22, 0  ;;  %p70_p2 = scmp.ne.s32.totalorder %s2449_s18, %s2445_s17 }
  0x17   : > { %p3226_p3 = scmp.eq.s32.totalorder %s2578_s23, 0  ;;  %p330_p4 = scmp.eq.s32.totalorder %s2578_s23, 1 }
  0x18   : > { %p2589_p5 = por %p65_p1, %p64_p0  ;;  %p336_p6 = scmp.eq.s32.totalorder %s1669_s24, 1 }
  0x19   : > { %p2595_p7 = por %p3226_p3, %p70_p2  ;;  %p2599_p8 = por %p330_p4, %p64_p0 }
  0x1a   : > { %p2603_p9 = por %p336_p6, %p70_p2  ;;  %p1670_p10 = scmp.ge.s32.totalorder %s2465_s22, 1 }
  0x1b   : > { %s3247_s27 = scalar_select %p2595_p7, 1, 0 }
  0x1c   : > { %s3249_s28 = scalar_select %p2599_p8, 1, 0 }
  0x1d   : > { %3248 = sst [smem:[#allocation33_spill]] %s3247_s27  ;;  %p343_p11 = scmp.lt.s32.totalorder %s2465_s22, 3 }
  0x1e   : > { %3250 = sst [smem:[#allocation34_spill]] %s3249_s28  ;;  %s1671_s30 = sshll.u32 %s2457_s20, 6 }
  0x1f   : > { %s3251_s29 = scalar_select %p2603_p9, 1, 0 }
  0x20   : > { %s3253_s2 = sld [smem:[#allocation36_spill]]  ;;  %p2615_p12 = pnand %p1670_p10, %p343_p11 }
  0x21   : > { %3252 = sst [smem:[#allocation35_spill]] %s3251_s29  ;;  %s2467_s16 = smov [#allocation7]  }
  0x22   : > { %s3254_s15 = scalar_select %p2615_p12, 1, 0 }
  0x23   : > { %s358_s24 = sshll.u32 %s2467_s16, 4  ;;  %p1881_p13 = pneg %p2615_p12  ;;  %s2619_s24 = int_to_ptr.vmem [resolvable:$true] %s358_s24 }
  0x24   : > { %p1926_p1 = scmp.lt.s32.totalorder %s2465_s22, 2  ;;  %s3255_s4 = sld [smem:[#allocation37_spill]] }
  0x25   : > { %p2632_p2 = pnand %p1881_p13, %p2595_p7  ;;  %p2638_p4 = pnand %p1881_p13, %p3226_p3 }
  0x26   : > { %s2613_s14 = scalar_lea.hbm %s3253_s2, %s1671_s30  ;;  %p2644_p6 = pnand %p1926_p1, %p2589_p5 }
  0x27   : > { %s3257_s16 = scalar_select %p2638_p4, 1, 0 }
  0x28   : > { %s3258_s17 = scalar_select %p2644_p6, 1, 0 }
  0x29   : > { %s2037_s12 = scalar_lea.hbm %s2613_s14, 64  ;;  %p2039_p11 = pneg %p2632_p2 }
  0x2a   : > { %s2628_s25 = scalar_lea.hbm %s3255_s4, %s1671_s30  ;;  %p2038_p10 = scmp.ne.s32.totalorder %s2613_s14, %s2037_s12 }
  0x2b   : > { %s2042_s11 = scalar_lea.hbm %s3253_s2, 128  ;;  %p2043_p13 = scmp.lt.u32.totalorder %s2613_s14, %s3253_s2 }
  0x2c   : > { %p2040_p0 = pnand %p2039_p11, %p2038_p10  ;;  %p2044_p5 = scmp.lt.u32.totalorder %s2042_s11, %s2037_s12 }
  0x2d   : > { %p2046_p3 = scmp.lt.u32.totalorder %s2037_s12, %s2613_s14 }
  0x2e   : > { %p2041_p9 = pneg %p2040_p0  ;;  %p2045_p1 = por %p2044_p5, %p2043_p13 }
  0x30   : > { %p2047_p8 = por %p2046_p3, %p2045_p1 }
  0x32   : > { %p2048_p7 = pnand %p2047_p8, %p2041_p9 }
  0x34   : > { %2051 = shalt.err (!%p2048_p7)
}
  0x35   : > { %s2052_s26 = scalar_lea.vmem %s2619_s24, 64  ;;  %p2060_p6 = scmp.lt.s32.totalorder %s2619_s24, %s2619_s24 }
  0x36   : > { %p2053_p0 = scmp.ne.s32.totalorder %s2619_s24, %s2052_s26  ;;  %p2061_p4 = scmp.lt.s32.totalorder %s2052_s26, %s2052_s26 }
  0x38   : > { %p2055_p10 = pnand %p2053_p0, %p2039_p11  ;;  %p2062_p5 = por %p2061_p4, %p2060_p6 }
  0x3a   : > { %p2056_p12 = pneg %p2055_p10 }
  0x3c   : > { %p2063_p13 = pnand %p2062_p5, %p2056_p12 }
  0x3e   : > { %2066 = shalt.err (!%p2063_p13)
}
  0x3f   : > { %1884 = dma.hbm_to_vmem [thread:$0]  (!%p2632_p2), %s2613_s14, 64, %s2619_s24, [#allocation6]  }
  0x40   : > { %s2468_s11 = smov [#allocation10]   ;;  %s2067_s28 = scalar_lea.hbm %s2628_s25, 64 }
  0x41   : > { %s371_s20 = sshll.u32 %s2468_s11, 4  ;;  %p2068_p3 = scmp.ne.s32.totalorder %s2628_s25, %s2067_s28  ;;  %s372_s20 = int_to_ptr.vmem [resolvable:$true] %s371_s20 }
  0x42   : > { %s2072_s13 = scalar_lea.hbm %s3255_s4, 128  ;;  %p2073_p9 = scmp.lt.u32.totalorder %s2628_s25, %s3255_s4 }
  0x43   : > { %p2070_p7 = pnand %p2068_p3, %p2039_p11  ;;  %p2074_p12 = scmp.lt.u32.totalorder %s2072_s13, %s2067_s28 }
  0x44   : > { %p2076_p6 = scmp.lt.u32.totalorder %s2067_s28, %s2628_s25 }
  0x45   : > { %p2071_p8 = pneg %p2070_p7  ;;  %p2075_p4 = por %p2074_p12, %p2073_p9 }
  0x47   : > { %p2077_p1 = por %p2076_p6, %p2075_p4 }
  0x49   : > { %p2078_p0 = pnand %p2077_p1, %p2071_p8 }
  0x4b   : > { %2081 = shalt.err (!%p2078_p0)
}
  0x4c   : > { %s2082_s14 = scalar_lea.vmem %s372_s20, 64  ;;  %p2090_p3 = scmp.lt.s32.totalorder %s372_s20, %s372_s20 }
  0x4d   : > { %p2083_p10 = scmp.ne.s32.totalorder %s372_s20, %s2082_s14  ;;  %p2091_p7 = scmp.lt.s32.totalorder %s2082_s14, %s2082_s14 }
  0x4f   : > { %p2085_p5 = pnand %p2083_p10, %p2039_p11  ;;  %p2092_p9 = por %p2091_p7, %p2090_p3 }
  0x51   : > { %p2086_p13 = pneg %p2085_p5 }
  0x53   : > { %p2093_p12 = pnand %p2092_p9, %p2086_p13 }
  0x55   : > { %2096 = shalt.err (!%p2093_p12)
}
  0x56   : > { %1887 = dma.hbm_to_vmem [thread:$0]  (!%p2632_p2), %s2628_s25, 64, %s372_s20, [#allocation9]  }
  0x57   : > { %s2469_s2 = smov [#allocation11]   ;;  %s3259_s5 = sld [smem:[#allocation38_spill]] }
  0x58   : > { %s381_s24 = sshll.u32 %s2469_s2, 4  ;;  %p3260_p8 = scmp.ne.s32.totalorder %s3257_s16, 0  ;;  %s382_s24 = int_to_ptr.vmem [resolvable:$true] %s381_s24 }
  0x5a   : > { %p2701_p4 = pneg %p3260_p8 }
  0x5d   : > { %s2097_s12 = scalar_lea.hbm %s3259_s5, 256 }
  0x5e   : > { %p2098_p11 = scmp.ne.s32.totalorder %s3259_s5, %s2097_s12  ;;  %p2104_p1 = scmp.lt.u32.totalorder %s2097_s12, %s3259_s5 }
  0x60   : > { %p2100_p6 = pnand %p2701_p4, %p2098_p11 }
  0x62   : > { %p2101_p2 = pneg %p2100_p6 }
  0x64   : > { %p2106_p0 = pnand %p2104_p1, %p2101_p2 }
  0x66   : > { %2109 = shalt.err (!%p2106_p0)
}
  0x67   : > { %s2110_s20 = scalar_lea.vmem %s382_s24, 256  ;;  %p2118_p3 = scmp.lt.s32.totalorder %s382_s24, %s382_s24 }
  0x68   : > { %p2111_p10 = scmp.ne.s32.totalorder %s382_s24, %s2110_s20  ;;  %p2119_p7 = scmp.lt.s32.totalorder %s2110_s20, %s2110_s20 }
  0x6a   : > { %p2113_p5 = pnand %p2111_p10, %p2701_p4  ;;  %p2120_p9 = por %p2119_p7, %p2118_p3 }
  0x6c   : > { %p2114_p13 = pneg %p2113_p5 }
  0x6e   : > { %p2121_p12 = pnand %p2120_p9, %p2114_p13 }
  0x70   : > { %2124 = shalt.err (!%p2121_p12)
}
  0x71   : > { %s2470_s14 = smov 128   ;;  %s2471_s2 = smov 8  }
  0x72   : > { %1890 = dma.hbm_to_vmem [thread:$0]  (!%p3260_p8), %s3259_s5, 256, %s382_s24, [#allocation12], %s2470_s14, %s2470_s14, %s2471_s2  }
  0x73   : > { %s2472_s12 = smov [#allocation14]   ;;  %s2473_s13 = smov [#allocation17]  }
  0x74   : > { %s408_s30 = sshll.u32 %s2472_s12, 4  ;;  %s432_s25 = sshll.u32 %s2473_s13, 4  ;;  %s409_s30 = int_to_ptr.vmem [resolvable:$true] %s408_s30  ;;  %s2717_s25 = int_to_ptr.vmem [resolvable:$true] %s432_s25 }
  0x75   : > { %s3262_s7 = sld [smem:[#allocation39_spill]] }
  0x7b   : > { %s2125_s4 = scalar_lea.hbm %s3262_s7, 16 }
  0x7c   : > { %p2126_p11 = scmp.ne.s32.totalorder %s3262_s7, %s2125_s4  ;;  %p2132_p1 = scmp.lt.u32.totalorder %s2125_s4, %s3262_s7 }
  0x7e   : > { %p2128_p6 = pnand %p2126_p11, %p2701_p4 }
  0x80   : > { %p2129_p2 = pneg %p2128_p6 }
  0x82   : > { %p2134_p0 = pnand %p2132_p1, %p2129_p2 }
  0x84   : > { %2137 = shalt.err (!%p2134_p0)
}
  0x85   : > { %s2138_s14 = scalar_lea.vmem %s409_s30, 16  ;;  %s2145_s2 = scalar_lea.vmem %s409_s30, 32 }
  0x86   : > { %p2139_p10 = scmp.ne.s32.totalorder %s409_s30, %s2138_s14  ;;  %p2146_p3 = scmp.lt.s32.totalorder %s409_s30, %s409_s30 }
  0x87   : > { %p2147_p7 = scmp.lt.s32.totalorder %s2145_s2, %s2138_s14 }
  0x88   : > { %p2141_p5 = pnand %p2139_p10, %p2701_p4 }
  0x89   : > { %p2148_p9 = por %p2147_p7, %p2146_p3 }
  0x8a   : > { %p2142_p13 = pneg %p2141_p5 }
  0x8c   : > { %p2149_p12 = pnand %p2148_p9, %p2142_p13 }
  0x8e   : > { %2152 = shalt.err (!%p2149_p12)
}
  0x8f   : > { %1896 = dma.hbm_to_vmem [thread:$0]  (!%p3260_p8), %s3262_s7, 16, %s409_s30, [#allocation15]  }
  0x90   : > { %s2153_s12 = scalar_lea.hbm %s3217_s9, 16 }
  0x91   : > { %p2154_p11 = scmp.ne.s32.totalorder %s3217_s9, %s2153_s12  ;;  %p2160_p1 = scmp.lt.u32.totalorder %s2153_s12, %s3217_s9 }
  0x93   : > { %p2156_p6 = pnand %p2154_p11, %p2701_p4 }
  0x95   : > { %p2157_p2 = pneg %p2156_p6 }
  0x97   : > { %p2162_p0 = pnand %p2160_p1, %p2157_p2 }
  0x99   : > { %2165 = shalt.err (!%p2162_p0)
}
  0x9a   : > { %s2166_s30 = scalar_lea.vmem %s2717_s25, 16  ;;  %s2173_s24 = scalar_lea.vmem %s2717_s25, 32 }
  0x9b   : > { %p2167_p10 = scmp.ne.s32.totalorder %s2717_s25, %s2166_s30  ;;  %p2174_p3 = scmp.lt.s32.totalorder %s2717_s25, %s2717_s25 }
  0x9c   : > { %p2175_p7 = scmp.lt.s32.totalorder %s2173_s24, %s2166_s30 }
  0x9d   : > { %p2169_p5 = pnand %p2167_p10, %p2701_p4 }
  0x9e   : > { %p2176_p9 = por %p2175_p7, %p2174_p3 }
  0x9f   : > { %p2170_p13 = pneg %p2169_p5 }
  0xa1   : > { %p2177_p12 = pnand %p2176_p9, %p2170_p13 }
  0xa3   : > { %2180 = shalt.err (!%p2177_p12)
}
  0xa4   : > { %1902 = dma.hbm_to_vmem [thread:$0]  (!%p3260_p8), %s3217_s9, 16, %s2717_s25, [#allocation18]  }
  0xa5   : > { %s2474_s23 = smov [#allocation13]   ;;  %s2181_s12 = scalar_lea.hbm %s3214_s6, 1024 }
  0xa6   : > { %s394_s27 = sshll.u32 %s2474_s23, 4  ;;  %p2182_p11 = scmp.ne.s32.totalorder %s3214_s6, %s2181_s12  ;;  %s395_s27 = int_to_ptr.vmem [resolvable:$true] %s394_s27 }
  0xa7   : > { %p2188_p1 = scmp.lt.u32.totalorder %s2181_s12, %s3214_s6 }
  0xa8   : > { %p2184_p6 = pnand %p2182_p11, %p2701_p4 }
  0xaa   : > { %p2185_p2 = pneg %p2184_p6 }
  0xac   : > { %p2190_p0 = pnand %p2188_p1, %p2185_p2 }
  0xae   : > { %2193 = shalt.err (!%p2190_p0)
}
  0xaf   : > { %s2194_s25 = scalar_lea.vmem %s395_s27, 1024  ;;  %p2202_p3 = scmp.lt.s32.totalorder %s395_s27, %s395_s27 }
  0xb0   : > { %p2195_p10 = scmp.ne.s32.totalorder %s395_s27, %s2194_s25  ;;  %p2203_p7 = scmp.lt.s32.totalorder %s2194_s25, %s2194_s25 }
  0xb2   : > { %p2197_p5 = pnand %p2195_p10, %p2701_p4  ;;  %p2204_p9 = por %p2203_p7, %p2202_p3 }
  0xb4   : > { %p2198_p13 = pneg %p2197_p5 }
  0xb6   : > { %p2205_p12 = pnand %p2204_p9, %p2198_p13 }
  0xb8   : > { %2208 = shalt.err (!%p2205_p12)
}
  0xb9   : > { %s2475_s30 = smov 64   ;;  %s2476_s24 = smov 4  }
  0xba   : > { %1893 = dma.hbm_to_vmem [thread:$0]  (!%p3260_p8), %s3214_s6, 1024, %s395_s27, [#allocation12], %s2475_s30, %s2475_s30, %s2476_s24  }
  0xbb   : > { %s2477_s23 = smov [#allocation16]   ;;  %s2478_s28 = smov [#allocation19]  }
  0xbc   : > { %s418_s4 = sshll.u32 %s2477_s23, 4  ;;  %s443_s12 = sshll.u32 %s2478_s28, 4  ;;  %s419_s4 = int_to_ptr.vmem [resolvable:$true] %s418_s4  ;;  %s444_s12 = int_to_ptr.vmem [resolvable:$true] %s443_s12 }
  0xbd   : > { %s2209_s20 = scalar_lea.hbm %s3216_s8, 1024 }
  0xbe   : > { %p2210_p11 = scmp.ne.s32.totalorder %s3216_s8, %s2209_s20  ;;  %p2216_p1 = scmp.lt.u32.totalorder %s2209_s20, %s3216_s8 }
  0xc0   : > { %p2212_p6 = pnand %p2210_p11, %p2701_p4 }
  0xc2   : > { %p2213_p2 = pneg %p2212_p6 }
  0xc4   : > { %p2218_p0 = pnand %p2216_p1, %p2213_p2 }
  0xc6   : > { %2221 = shalt.err (!%p2218_p0)
}
  0xc7   : > { %s2222_s27 = scalar_lea.vmem %s419_s4, 1024  ;;  %p2230_p3 = scmp.lt.s32.totalorder %s419_s4, %s419_s4 }
  0xc8   : > { %p2223_p10 = scmp.ne.s32.totalorder %s419_s4, %s2222_s27  ;;  %p2231_p7 = scmp.lt.s32.totalorder %s2222_s27, %s2222_s27 }
  0xca   : > { %p2225_p5 = pnand %p2223_p10, %p2701_p4  ;;  %p2232_p9 = por %p2231_p7, %p2230_p3 }
  0xcc   : > { %p2226_p13 = pneg %p2225_p5 }
  0xce   : > { %p2233_p12 = pnand %p2232_p9, %p2226_p13 }
  0xd0   : > { %2236 = shalt.err (!%p2233_p12)
}
  0xd1   : > { %1899 = dma.hbm_to_vmem [thread:$0]  (!%p3260_p8), %s3216_s8, 1024, %s419_s4, [#allocation15], %s2475_s30, %s2475_s30, %s2476_s24  }
  0xd2   : > { %s2237_s23 = scalar_lea.hbm %s3218_s10, 16 }
  0xd3   : > { %p2238_p11 = scmp.ne.s32.totalorder %s3218_s10, %s2237_s23  ;;  %p2244_p1 = scmp.lt.u32.totalorder %s2237_s23, %s3218_s10 }
  0xd5   : > { %p2240_p6 = pnand %p2238_p11, %p2701_p4 }
  0xd7   : > { %p2241_p2 = pneg %p2240_p6 }
  0xd9   : > { %p2246_p0 = pnand %p2244_p1, %p2241_p2 }
  0xdb   : > { %2249 = shalt.err (!%p2246_p0)
}
  0xdc   : > { %s2250_s11 = scalar_lea.vmem %s444_s12, 16  ;;  %s2257_s4 = scalar_lea.vmem %s444_s12, 32 }
  0xdd   : > { %p2251_p10 = scmp.ne.s32.totalorder %s444_s12, %s2250_s11  ;;  %p2258_p3 = scmp.lt.s32.totalorder %s444_s12, %s444_s12 }
  0xde   : > { %p2259_p7 = scmp.lt.s32.totalorder %s2257_s4, %s2250_s11 }
  0xdf   : > { %p2253_p5 = pnand %p2251_p10, %p2701_p4 }
  0xe0   : > { %p2260_p9 = por %p2259_p7, %p2258_p3 }
  0xe1   : > { %p2254_p13 = pneg %p2253_p5 }
  0xe3   : > { %p2261_p12 = pnand %p2260_p9, %p2254_p13 }
  0xe5   : > { %2264 = shalt.err (!%p2261_p12)
}
  0xe6   : > { %1905 = dma.hbm_to_vmem [thread:$0]  (!%p3260_p8), %s3218_s10, 16, %s444_s12, [#allocation18]  }
  0xe7   : > { %s2822_s26 = sand.u32 1, %s2453_s19   ;;  %s48_s5 = sadd.s32 1, %s2461_s21 }
  0xe8   : > { %p50_p4 = scmp.ge.s32.totalorder %s48_s5, 2  ;;  %s1680_s7 = sshll.u32 %s2822_s26, 5 }
  0xe9   : > { %s1740_s14 = sshll.u32 %s2461_s21, 9  ;;  %s458_s12 = scalar_lea.vmem [#allocation2], %s1680_s7 }
  0xea   : > { %s3296_s5 = smov (%p50_p4, %s48_s5), 0  ;;  %s2832_s23 = scalar_lea.hbm %s3208_s0, %s1740_s14 }
  0xeb   : > { %s466_s28 = sshll.u32 %s458_s12, 4  ;;  %s54_s13 = ssub.s32 %s2461_s21, %s3296_s5  ;;  %s2836_s28 = int_to_ptr.vmem [resolvable:$true] %s466_s28 }
  0xec   : > { %p2838_p8 = scmp.eq.s32.totalorder %s54_s13, 0  ;;  %s455_s11 = scalar_lea.sflag [#allocation3], %s2822_s26 }
  0xed   : > { %s2265_s4 = scalar_lea.hbm %s2832_s23, 512  ;;  %p3264_p6 = scmp.ne.s32.totalorder %s3258_s17, 0 }
  0xee   : > { %s3263_s29 = scalar_select %p2838_p8, 1, 0 }
  0xef   : > { %p2266_p11 = scmp.ne.s32.totalorder %s2832_s23, %s2265_s4  ;;  %p2848_p2 = pneg %p3264_p6 }
  0xf0   : > { %s2270_s14 = scalar_lea.hbm %s3208_s0, 1024  ;;  %p2271_p10 = scmp.lt.u32.totalorder %s2832_s23, %s3208_s0 }
  0xf1   : > { %p2268_p1 = pnand %p2848_p2, %p2266_p11  ;;  %p2272_p5 = scmp.lt.u32.totalorder %s2270_s14, %s2265_s4 }
  0xf2   : > { %p2274_p3 = scmp.lt.u32.totalorder %s2265_s4, %s2832_s23 }
  0xf3   : > { %p2269_p0 = pneg %p2268_p1  ;;  %p2273_p13 = por %p2272_p5, %p2271_p10 }
  0xf5   : > { %p2275_p7 = por %p2274_p3, %p2273_p13 }
  0xf7   : > { %p2276_p9 = pnand %p2275_p7, %p2269_p0 }
  0xf9   : > { %2279 = shalt.err (!%p2276_p9)
}
  0xfa   : > { %s2280_s12 = scalar_lea.vmem %s2836_s28, 512  ;;  %s2479_s13 = smov [#allocation2]  }
  0xfb   : > { %p2281_p12 = scmp.ne.s32.totalorder %s2836_s28, %s2280_s12  ;;  %s2285_s27 = sshll.u32 %s2479_s13, 4  ;;  %s2286_s27 = int_to_ptr.vmem [resolvable:$false] %s2285_s27 }
  0xfc   : > { %s2287_s7 = scalar_lea.vmem %s2286_s27, 1024  ;;  %p2288_p1 = scmp.lt.s32.totalorder %s2836_s28, %s2286_s27 }
  0xfd   : > { %p2283_p4 = pnand %p2281_p12, %p2848_p2  ;;  %p2289_p8 = scmp.lt.s32.totalorder %s2287_s7, %s2280_s12 }
  0xff   : > { %p2284_p11 = pneg %p2283_p4  ;;  %p2290_p10 = por %p2289_p8, %p2288_p1 }
 0x101   : > { %p2291_p5 = pnand %p2290_p10, %p2284_p11 }
 0x103   : > { %2294 = shalt.err (!%p2291_p5)
}
 0x104   : > { %1909 = dma.hbm_to_vmem [thread:$0]  (!%p3264_p6), %s2832_s23, 512, %s2836_s28, %s455_s11, %s2475_s30, %s2475_s30, %s2476_s24  }
 0x105   : > { %s3266_s4 = sadd.s32 1, %s2453_s19  ;;  %p3267_p8 = scmp.ne.s32.totalorder %s3263_s29, 0 }
 0x106   : > { %s1683_s16 = sshll.u32 %s2822_s26, 2  ;;  %s1684_s2 = sshll.u32 %s2461_s21, 6 }
 0x107   : > { %s2881_s14 = scalar_select %p3267_p8, %s2453_s19, %s3266_s4  }
 0x108   : > { %s2890_s27 = scalar_lea.hbm %s3209_s1, %s1684_s2  ;;  %s480_s7 = scalar_lea.vmem [#allocation5], %s1683_s16 }
 0x109   : > { %s488_s20 = sshll.u32 %s480_s7, 4  ;;  %s3268_s30 = sand.u32 1, %s2465_s22   ;;  %s489_s20 = int_to_ptr.vmem [resolvable:$true] %s488_s20 }
 0x10a   : > { %s477_s24 = scalar_lea.sflag [#allocation6], %s3268_s30  ;;  %s2295_s23 = scalar_lea.hbm %s2890_s27, 64 }
 0x10b   : > { %p2296_p0 = scmp.ne.s32.totalorder %s2890_s27, %s2295_s23  ;;  %s2300_s11 = scalar_lea.hbm %s3209_s1, 128 }
 0x10c   : > { %p2301_p7 = scmp.lt.u32.totalorder %s2890_s27, %s3209_s1  ;;  %p2302_p9 = scmp.lt.u32.totalorder %s2300_s11, %s2295_s23 }
 0x10d   : > { %p2298_p13 = pnand %p2296_p0, %p2848_p2  ;;  %p2304_p4 = scmp.lt.u32.totalorder %s2295_s23, %s2890_s27 }
 0x10e   : > { %p2303_p12 = por %p2302_p9, %p2301_p7 }
 0x10f   : > { %p2299_p3 = pneg %p2298_p13 }
 0x110   : > { %p2305_p11 = por %p2304_p4, %p2303_p12 }
 0x112   : > { %p2306_p1 = pnand %p2305_p11, %p2299_p3 }
 0x114   : > { %2309 = shalt.err (!%p2306_p1)
}
 0x115   : > { %s2310_s13 = scalar_lea.vmem %s489_s20, 64  ;;  %s2480_s7 = smov [#allocation5]  }
 0x116   : > { %p2311_p10 = scmp.ne.s32.totalorder %s489_s20, %s2310_s13  ;;  %s2315_s30 = sshll.u32 %s2480_s7, 4  ;;  %s2316_s30 = int_to_ptr.vmem [resolvable:$false] %s2315_s30 }
 0x117   : > { %s2317_s28 = scalar_lea.vmem %s2316_s30, 128  ;;  %p2318_p0 = scmp.lt.s32.totalorder %s489_s20, %s2316_s30 }
 0x118   : > { %p2313_p5 = pnand %p2311_p10, %p2848_p2  ;;  %p2319_p13 = scmp.lt.s32.totalorder %s2317_s28, %s2310_s13 }
 0x11a   : > { %p2314_p8 = pneg %p2313_p5  ;;  %p2320_p6 = por %p2319_p13, %p2318_p0 }
 0x11c   : > { %p2321_p7 = pnand %p2320_p6, %p2314_p8 }
 0x11e   : > { %2324 = shalt.err (!%p2321_p7)
}
 0x11f   : > { %p3269_p9 = scmp.ne.s32.totalorder %s3258_s17, 0  ;;  %s2918_s11 = scalar_lea.hbm %s3211_s3, %s1684_s2 }
 0x120   : > { %s499_s4 = scalar_lea.vmem [#allocation8], %s1683_s16  ;;  %s3270_s13 = sand.u32 1, %s2465_s22  }
 0x121   : > { %1912 = dma.hbm_to_vmem [thread:$0]  (!%p3269_p9), %s2890_s27, 64, %s489_s20, %s477_s24  }
 0x122   : > { %s507_s12 = sshll.u32 %s499_s4, 4  ;;  %s496_s7 = scalar_lea.sflag [#allocation9], %s3270_s13  ;;  %s508_s12 = int_to_ptr.vmem [resolvable:$true] %s507_s12 }
 0x123   : > { %s2325_s30 = scalar_lea.hbm %s2918_s11, 64  ;;  %s2330_s2 = scalar_lea.hbm %s3211_s3, 128 }
 0x124   : > { %p2326_p6 = scmp.ne.s32.totalorder %s2918_s11, %s2325_s30  ;;  %p2331_p4 = scmp.lt.u32.totalorder %s2918_s11, %s3211_s3 }
 0x125   : > { %p2332_p11 = scmp.lt.u32.totalorder %s2330_s2, %s2325_s30  ;;  %p2334_p10 = scmp.lt.u32.totalorder %s2325_s30, %s2918_s11 }
 0x126   : > { %p2328_p3 = pnand %p2326_p6, %p2848_p2 }
 0x127   : > { %p2333_p1 = por %p2332_p11, %p2331_p4 }
 0x128   : > { %p2329_p12 = pneg %p2328_p3 }
 0x129   : > { %p2335_p5 = por %p2334_p10, %p2333_p1 }
 0x12b   : > { %p2336_p8 = pnand %p2335_p5, %p2329_p12 }
 0x12d   : > { %2339 = shalt.err (!%p2336_p8)
}
 0x12e   : > { %s2340_s16 = scalar_lea.vmem %s508_s12, 64  ;;  %s2481_s28 = smov [#allocation8]  }
 0x12f   : > { %p2341_p0 = scmp.ne.s32.totalorder %s508_s12, %s2340_s16  ;;  %s2345_s23 = sshll.u32 %s2481_s28, 4  ;;  %s2346_s23 = int_to_ptr.vmem [resolvable:$false] %s2345_s23 }
 0x130   : > { %s2347_s29 = scalar_lea.vmem %s2346_s23, 128  ;;  %p2348_p6 = scmp.lt.s32.totalorder %s508_s12, %s2346_s23 }
 0x131   : > { %p2343_p13 = pnand %p2341_p0, %p2848_p2  ;;  %p2349_p3 = scmp.lt.s32.totalorder %s2347_s29, %s2340_s16 }
 0x133   : > { %p2344_p7 = pneg %p2343_p13  ;;  %p2350_p9 = por %p2349_p3, %p2348_p6 }
 0x135   : > { %p2351_p4 = pnand %p2350_p9, %p2344_p7 }
 0x137   : > { %2354 = shalt.err (!%p2351_p4)
}
 0x138   : > { %p3271_p11 = scmp.ne.s32.totalorder %s3258_s17, 0  ;;  %p3272_p12 = scmp.ne.s32.totalorder %s3254_s15, 0 }
 0x139   : > { %s3273_s25 = sld [smem:[#allocation33_spill]] (!%p3272_p12)  ;;  %s2944_s4 = sand.u32 (!%p3272_p12), 1, %s2449_s18  }
 0x13a   : > { %1915 = dma.hbm_to_vmem [thread:$0]  (!%p3271_p11), %s2918_s11, 64, %s508_s12, %s496_s7  }
 0x13b   : > { %516 = sbr.rel (%p3272_p12) target bundleno = 1237 (0x4d5), region = 64  ;;  %s1688_s13 = sshll.u32 (!%p3272_p12), %s2944_s4, 5 }
 0x13c   : > { %s519_s30 = scalar_lea.sflag (!%p3272_p12), [#allocation3], %s2944_s4  ;;  %s2950_s20 = scalar_lea.vmem (!%p3272_p12), [#allocation2], %s1688_s13 }
 0x13f   : > { %p3274_p2 = scmp.ne.s32.totalorder (!%p3272_p12), %s3273_s25, 0 }
 0x142   : > { %2408 = dma.done.wait (%p3274_p2), %s519_s30, 512  }
 0x143   : > { %2410 = vsyncadd (%p3274_p2), %s519_s30, 4294966784  ;;  %s3275_s17 = sld [smem:[#allocation32_spill]]  ;;  %s1689_s11 = sshll.u32 %s2944_s4, 2 }
 0x144   : > { %s2958_s7 = scalar_lea.vmem [#allocation5], %s1689_s11 }
 0x149   : > { %s527_s15 = sand.u32 1, %s3275_s17  }
 0x14a   : > { %s528_s12 = scalar_lea.sflag [#allocation6], %s527_s15 }
 0x14b   : > { %2412 = dma.done.wait (%p3274_p2), %s528_s12, 64  }
 0x14c   : > { %2414 = vsyncadd (%p3274_p2), %s528_s12, 4294967232 }
 0x14d   : > { %2416 = dma.done.wait (%p3274_p2), [#allocation6], 64  }
 0x14e   : > { %2418 = vsyncadd (%p3274_p2), [#allocation6], 4294967232  ;;  %s541_s27 = scalar_lea.sflag [#allocation9], %s527_s15  ;;  %s2968_s2 = scalar_lea.vmem [#allocation8], %s1689_s11 }
 0x14f   : > { %2420 = dma.done.wait (%p3274_p2), %s541_s27, 64  }
 0x150   : > { %2422 = vsyncadd (%p3274_p2), %s541_s27, 4294967232 }
 0x151   : > { %2424 = dma.done.wait (%p3274_p2), [#allocation9], 64  }
 0x152   : > { %2426 = vsyncadd (%p3274_p2), [#allocation9], 4294967232  ;;  %p3276_p9 = scmp.eq.s32.totalorder %s3275_s17, 0 }
 0x154   : > { %2428 = dma.done.wait (%p3276_p9), [#allocation12], 1280   ;;  %p3277_p1 = pmov %p3276_p9 }
 0x156   : > { %2430 = vsyncadd (%p3277_p1), [#allocation12], 4294966016  ;;  %p3278_p10 = pmov %p3277_p1 }
 0x157   : > { %p3279_p5 = pmov %p3277_p1 }
 0x158   : > { %2432 = dma.done.wait (%p3278_p10), [#allocation15], 1040  }
 0x159   : > { %2434 = vsyncadd (%p3279_p5), [#allocation15], 4294966256  ;;  %p3280_p8 = pmov %p3277_p1 }
 0x15a   : > { %p3281_p0 = pmov %p3277_p1 }
 0x15b   : > { %2436 = dma.done.wait (%p3280_p8), [#allocation18], 32  }
 0x15c   : > { %2438 = vsyncadd (%p3281_p0), [#allocation18], 4294967264  ;;  %v2482_v0 = vmov 0   ;;  %v1998_v1 = vld [vmem:[#allocation11 + $0x4] ss:$8 sps:$4 sm:$0xff]   ;;  %vm666_vm0 = vcmask 130048   ;;  %v759_v23 = vlaneseq }
 0x15d   : > { %711 = vmatprep.mubr.bf16.mxu0 %v2482_v0  ;;  %v2000_v2 = vld [vmem:[#allocation11] ss:$8 sps:$4 sm:$0xff]   ;;  %679 = vmatprep.subr.bf16.mxu0 %v1998_v1  ;;  %v2005_v4 = vld [vmem:[#allocation13] sm:$0xff]   ;;  %v2006_v5 = vld [vmem:[#allocation13 + $0x8] sm:$0xff]   ;;  %v2483_v21 = vmov 1966171168  }
 0x15e   : > { %v2001_v3 = vld [vmem:[%s2950_s20] sm:$0xff]   ;;  %680 = vmatpush1.bf16.msra.mxu0 %v2000_v2  ;;  %v2002_v6 = vld [vmem:[%s2950_s20 + $0x8] sm:$0xff]   ;;  %1797 = vmatprep.subr.bf16.mxu1 %v2005_v4  ;;  %v2007_v7 = vld [vmem:[#allocation13 + $0x10] sm:$0xff]   ;;  %v757_v22 = vunpack.c.l.s4 %v2483_v21  ;;  %v760_v25 = vshrl.u32 %v759_v23, 7  ;;  %s3130_s24 = scalar_lea.vmem [#allocation20], %s1688_s13  ;;  %s3282_s26 = sld [smem:[#allocation31_spill]] }
 0x15f   : > { %1798 = vmatpush3.bf16.msra.mxu1 %v2005_v4  ;;  %v2008_v8 = vld [vmem:[#allocation13 + $0x18] sm:$0xff]   ;;  %v2003_v9 = vld [vmem:[%s2950_s20 + $0x10] sm:$0xff]   ;;  %v2004_v10 = vld [vmem:[%s2950_s20 + $0x18] sm:$0xff]   ;;  %s3283_s16 = sld [smem:[#allocation34_spill]]  ;;  %s1458_s23 = sshll.u32 %s3130_s24, 4  ;;  %s3158_s23 = int_to_ptr.vmem [resolvable:$true] %s1458_s23 }
 0x160   : > { %1799 = vmatprep.subr.bf16.mxu1 %v2006_v5  ;;  %v2009_v11 = vld [vmem:[#allocation13 + $0x20] sm:$0xff]   ;;  %v2010_v12 = vld [vmem:[#allocation13 + $0x28] sm:$0xff]   ;;  %v2011_v13 = vld [vmem:[#allocation13 + $0x30] sm:$0xff]   ;;  %v758_v24 = vunpack.c.0.s8 %v757_v22  ;;  %v3003_v32 = vsub.s32 0, %v760_v25  ;;  %s3284_s13 = sld [smem:[#allocation40_spill]]  ;;  %s1444_s20 = scalar_lea.sflag [#allocation4], %s2944_s4 }
 0x161   : > { %1704 = vmatmul.mubr.msk.bf16.vlgmr.msra.gmra.mrb[0].mxu0 %vm666_vm0, %v2001_v3  ;;  %v2012_v14 = vld [vmem:[#allocation13 + $0x38] sm:$0xff]   ;;  %v2013_v15 = vld [vmem:[#allocation16] sm:$0xff]   ;;  %v2014_v16 = vld [vmem:[#allocation16 + $0x8] sm:$0xff]   ;;  %s2355_s17 = scalar_lea.vmem %s3158_s23, 512  ;;  %s2484_s15 = smov [#allocation20]  }
 0x162   : > { %721 = vmatprep.mubr.bf16.mxu0 %v2482_v0  ;;  %1821 = vmatprep.subr.bf16.mxu0 %v2013_v15  ;;  %v2015_v17 = vld [vmem:[#allocation16 + $0x10] sm:$0xff]   ;;  %v2016_v18 = vld [vmem:[#allocation16 + $0x18] sm:$0xff]   ;;  %v2017_v19 = vld [vmem:[#allocation16 + $0x20] sm:$0xff]   ;;  %v2999_v28 = vsub.s32 %v758_v24, %v760_v25  ;;  %p2356_p13 = scmp.ne.s32.totalorder %s3158_s23, %s2355_s17  ;;  %s2359_s11 = sshll.u32 %s2484_s15, 4  ;;  %s2360_s11 = int_to_ptr.vmem [resolvable:$false] %s2359_s11 }
 0x163   : > { %1800 = vmatpush3.bf16.msra.mxu1 %v2006_v5  ;;  %1822 = vmatpush3.bf16.msra.mxu0 %v2013_v15  ;;  %v2018_v20 = vld [vmem:[#allocation16 + $0x28] sm:$0xff]   ;;  %v752_v26 = vld [vmem:[%s2958_s7] sm:$0xf]  ;;  %v852_v34 = vld [vmem:[#allocation7] sm:$0xf]  ;;  %s2361_s12 = scalar_lea.vmem %s2360_s11, 1024  ;;  %p2362_p4 = scmp.lt.s32.totalorder %s3158_s23, %s2360_s11 }
 0x164   : > { %1801 = vmatprep.subr.bf16.mxu1 %v2007_v7  ;;  %1823 = vmatprep.subr.bf16.mxu0 %v2014_v16  ;;  %v753_v27 = vunpack.c.l.bf16 %v752_v26  ;;  %v853_v37 = vunpack.c.l.bf16 %v852_v34  ;;  %s1749_s28 = sshll.u32 %s3282_s26, 9  ;;  %p2363_p11 = scmp.lt.s32.totalorder %s2361_s12, %s2355_s17 }
 0x165   : > { %p3285_p7 = scmp.ne.s32.totalorder %s3283_s16, 0 }
 0x166   : > { %v762_v29 = vrot.slane %v753_v27, %v2999_v28  ;;  %v755_v38 = vcombine.high %v753_v27, %v753_v27  ;;  %s3156_s30 = scalar_lea.hbm %s3284_s13, %s1749_s28  ;;  %p2364_p12 = por %p2363_p11, %p2362_p4 }
 0x167   : > { %1802 = vmatpush3.bf16.msra.mxu1 %v2007_v7  ;;  %1824 = vmatpush3.bf16.msra.mxu0 %v2014_v16  ;;  %p2357_p6 = pnand %p2356_p13, %p3285_p7 }
 0x168   : > { %1803 = vmatprep.subr.bf16.mxu1 %v2008_v8  ;;  %1825 = vmatprep.subr.bf16.mxu0 %v2015_v17  ;;  %v770_v30 = vcombine.high %v762_v29, %v762_v29  ;;  %v778_v31 = vrot.slane %v762_v29, %v2999_v28  ;;  %v769_v48 = vrot.slane %v755_v38, %v2999_v28  ;;  %v1708_v38 = vld [vmem:[#allocation14] ss:$0 sm:$0xff] }
 0x169   : > { %1705 = vmatmul.mubr.msk.bf16.gmra.mrb[4].mxu0 %vm666_vm0, %v2002_v6  ;;  %p2358_p3 = pneg %p2357_p6 }
 0x16a   : > { %731 = vmatprep.mubr.bf16.mxu0 %v2482_v0  ;;  %v792_v33 = vrot.slane %v770_v30, %v2999_v28  ;;  %v807_v35 = vrot.slane %v778_v31, %v3003_v32  ;;  %v800_v42 = vcombine.high %v778_v31, %v778_v31  ;;  %v771_v54 = vcombine.high %v769_v48, %v769_v48 }
 0x16b   : > { %1804 = vmatpush3.bf16.msra.mxu1 %v2008_v8  ;;  %1826 = vmatpush3.bf16.msra.mxu0 %v2015_v17  ;;  %v785_v59 = vrot.slane %v769_v48, %v2999_v28  ;;  %p2365_p2 = pnand %p2364_p12, %p2358_p3 }
 0x16c   : > { %1805 = vmatprep.subr.bf16.mxu1 %v2009_v11  ;;  %1827 = vmatprep.subr.bf16.mxu0 %v2016_v18  ;;  %v811_v36 = vrot.slane %v792_v33, %v3003_v32  ;;  %v802_v46 = vcombine.high %v792_v33, %v792_v33  ;;  %v815_v49 = vrot.slane %v800_v42, %v3003_v32 }
 0x16d   : > { %v823_v2 = vrot.slane %v785_v59, %v3003_v32 }
 0x16e   : > { %v819_v51 = vrot.slane %v802_v46, %v3003_v32 }
 0x16f   : > { %1806 = vmatpush3.bf16.msra.mxu1 %v2009_v11  ;;  %1828 = vmatpush3.bf16.msra.mxu0 %v2016_v18 }
 0x170   : > { %1807 = vmatprep.subr.bf16.mxu1 %v2010_v12  ;;  %1829 = vmatprep.subr.bf16.mxu0 %v2017_v19 }
 0x171   : > { %1706 = vmatmul.mubr.msk.bf16.gmra.mrb[8].mxu0 %vm666_vm0, %v2003_v9 }
 0x172   : > { %741 = vmatprep.mubr.bf16.mxu0 %v2482_v0  ;;  %v799_v0 = vrot.slane %v771_v54, %v2999_v28 }
 0x173   : > { %1808 = vmatpush3.bf16.msra.mxu1 %v2010_v12  ;;  %1830 = vmatpush3.bf16.msra.mxu0 %v2017_v19 }
 0x174   : > { %1809 = vmatprep.subr.bf16.mxu1 %v2011_v13  ;;  %1831 = vmatprep.subr.bf16.mxu0 %v2018_v20  ;;  %v827_v5 = vrot.slane %v799_v0, %v3003_v32  ;;  %v803_v15 = vcombine.high %v799_v0, %v799_v0 }
 0x177   : > { %1810 = vmatpush3.bf16.msra.mxu1 %v2011_v13  ;;  %1832 = vmatpush3.bf16.msra.mxu0 %v2018_v20  ;;  %v835_v20 = vrot.slane %v803_v15, %v3003_v32 }
 0x178   : > { %1811 = vmatprep.subr.bf16.mxu1 %v2012_v14 }
 0x179   : > { %1707 = vmatmul.mubr.msk.bf16.gmra.mrb[12].mxu0 %vm666_vm0, %v2004_v10  ;;  %v801_v10 = vcombine.high %v785_v59, %v785_v59 }
 0x17b   : > { %1812 = vmatpush3.bf16.msra.mxu1 %v2012_v14  ;;  %v831_v17 = vrot.slane %v801_v10, %v3003_v32 }
 0x234   : > { %v713_v39 = vpop.f32.mrb[0].mxu0 }
 0x235   : > { %v844_v40 = vadd.f32 %v807_v35, %v713_v39  ;;  %v3008_v41 = vpop.f32.mrb[1].mxu0  ;;  %v2019_v35 = vld [vmem:[#allocation16 + $0x30] sm:$0xff]  }
 0x236   : > { %v717_v43 = vpop.f32.mrb[2].mxu0  ;;  %1833 = vmatprep.subr.bf16.mxu0 %v2019_v35 }
 0x237   : > { %v845_v44 = vadd.f32 %v811_v36, %v717_v43  ;;  %v3010_v45 = vpop.f32.mrb[3].mxu0  ;;  %v854_v47 = vadd.f32 %v853_v37, %v844_v40  ;;  %1834 = vmatpush3.bf16.msra.mxu0 %v2019_v35  ;;  %v2020_v36 = vld [vmem:[#allocation16 + $0x38] sm:$0xff]  }
 0x238   : > { %1835 = vmatprep.subr.bf16.mxu0 %v2020_v36 }
 0x239   : > { %v855_v50 = vadd.f32 %v853_v37, %v845_v44  ;;  %v862_v52 = vmax.f32 %v854_v47, 0.0 }
 0x23b   : > { %v863_v53 = vmax.f32 %v855_v50, 0.0  ;;  %1836 = vmatpush3.bf16.msra.mxu0 %v2020_v36 }
 0x23c   : > { %v723_v55 = vpop.f32.mrb[4].mxu0 }
 0x23d   : > { %v846_v56 = vadd.f32 %v815_v49, %v723_v55  ;;  %v3015_v57 = vpop.f32.mrb[5].mxu0  ;;  %v870_v58 = vpack.c.bf16 %v863_v53, %v862_v52 }
 0x23e   : > { %v727_v60 = vpop.f32.mrb[6].mxu0 }
 0x23f   : > { %v856_v61 = vadd.f32 %v853_v37, %v846_v56  ;;  %v847_v62 = vadd.f32 %v819_v51, %v727_v60  ;;  %v3018_v63 = vpop.f32.mrb[7].mxu0  ;;  %1813 = vmatprep.mubr.bf16.mxu1 %v870_v58 }
 0x241   : > { %v857_v1 = vadd.f32 %v853_v37, %v847_v62  ;;  %v864_v3 = vmax.f32 %v856_v61, 0.0 }
 0x243   : > { %v865_v4 = vmax.f32 %v857_v1, 0.0 }
 0x244   : > { %v733_v6 = vpop.f32.mrb[8].mxu0 }
 0x245   : > { %v848_v7 = vadd.f32 %v823_v2, %v733_v6  ;;  %v3023_v8 = vpop.f32.mrb[9].mxu0  ;;  %v871_v9 = vpack.c.bf16 %v865_v4, %v864_v3  ;;  %v1151_v6 = vld [vmem:[%s2968_s2] sm:$0xf] }
 0x246   : > { %v737_v11 = vpop.f32.mrb[10].mxu0 }
 0x247   : > { %v858_v12 = vadd.f32 %v853_v37, %v848_v7  ;;  %v849_v13 = vadd.f32 %v827_v5, %v737_v11  ;;  %v3025_v14 = vpop.f32.mrb[11].mxu0  ;;  %1814 = vmatmul.mubr.bf16.vlgmr.msra.gmra.mrb[0].mxu1 %v871_v9  ;;  %v1152_v7 = vunpack.c.l.bf16 %v1151_v6 }
 0x249   : > { %v859_v16 = vadd.f32 %v853_v37, %v849_v13  ;;  %v866_v18 = vmax.f32 %v858_v12, 0.0  ;;  %v1161_v9 = vrot.slane %v1152_v7, %v2999_v28 }
 0x24b   : > { %v867_v19 = vmax.f32 %v859_v16, 0.0  ;;  %v1169_v10 = vcombine.high %v1161_v9, %v1161_v9  ;;  %v1177_v11 = vrot.slane %v1161_v9, %v2999_v28  ;;  %v1154_v16 = vcombine.high %v1152_v7, %v1152_v7 }
 0x24c   : > { %v743_v21 = vpop.f32.mrb[12].mxu0 }
 0x24d   : > { %v850_v22 = vadd.f32 %v831_v17, %v743_v21  ;;  %v3029_v23 = vpop.f32.mrb[13].mxu0  ;;  %v872_v24 = vpack.c.bf16 %v867_v19, %v866_v18  ;;  %v1191_v12 = vrot.slane %v1169_v10, %v2999_v28  ;;  %v1199_v13 = vcombine.high %v1177_v11, %v1177_v11  ;;  %v1251_v17 = vld [vmem:[#allocation10] sm:$0xf] }
 0x24e   : > { %v747_v25 = vpop.f32.mrb[14].mxu0 }
 0x24f   : > { %v860_v26 = vadd.f32 %v853_v37, %v850_v22  ;;  %v851_v27 = vadd.f32 %v835_v20, %v747_v25  ;;  %v3031_v29 = vpop.f32.mrb[15].mxu0  ;;  %1817 = vmatprep.mubr.bf16.mxu1 %v872_v24  ;;  %v1201_v15 = vcombine.high %v1191_v12, %v1191_v12  ;;  %v1214_v18 = vrot.slane %v1199_v13, %v3003_v32 }
 0x250   : > { %v1206_v20 = vrot.slane %v1177_v11, %v3003_v32  ;;  %v1252_v25 = vunpack.c.l.bf16 %v1251_v17 }
 0x251   : > { %v861_v30 = vadd.f32 %v853_v37, %v851_v27  ;;  %v868_v31 = vmax.f32 %v860_v26, 0.0  ;;  %v1218_v24 = vrot.slane %v1201_v15, %v3003_v32  ;;  %v1168_v26 = vrot.slane %v1154_v16, %v2999_v28 }
 0x253   : > { %v869_v33 = vmax.f32 %v861_v30, 0.0 }
 0x255   : > { %v873_v34 = vpack.c.bf16 %v869_v33, %v868_v31 }
 0x257   : > { %1818 = vmatmul.mubr.bf16.gmra.mrb[4].mxu1 %v873_v34 }
 0x31a   : > { %v1815_v39 = vpop.f32.mrb[0].mxu1 }
 0x31b   : > { %v988_v40 = vadd.f32 %v1815_v39, %v1708_v38  ;;  %v979_v42 = vpop.f32.mrb[1].mxu1  ;;  %v1210_v39 = vrot.slane %v1191_v12, %v3003_v32 }
 0x31c   : > { %v980_v43 = vadd.f32 %v1708_v38, %v979_v42  ;;  %v1816_v44 = vpop.f32.mrb[2].mxu1 }
 0x31d   : > { %v991_v46 = vadd.f32 %v1816_v44, %v1708_v38  ;;  %v982_v47 = vpop.f32.mrb[3].mxu1  ;;  %v1012_v37 = vmax.f32 %v988_v40, 0.0  ;;  %v1170_v40 = vcombine.high %v1168_v26, %v1168_v26 }
 0x31e   : > { %v983_v48 = vadd.f32 %v1708_v38, %v982_v47  ;;  %v1010_v50 = vmax.f32 %v980_v43, 0.0 }
 0x31f   : > { %v1013_v49 = vmax.f32 %v991_v46, 0.0  ;;  %v1198_v44 = vrot.slane %v1170_v40, %v2999_v28 }
 0x320   : > { %v1011_v51 = vmax.f32 %v983_v48, 0.0 }
 0x321   : > { %v1019_v52 = vpack.c.bf16 %v1013_v49, %v1012_v37  ;;  %v1202_v37 = vcombine.high %v1198_v44, %v1198_v44 }
 0x322   : > { %v1018_v53 = vpack.c.bf16 %v1011_v51, %v1010_v50 }
 0x324   : > { %1837 = vmatprep.mubr.bf16.mxu0 %v1018_v53 }
 0x325   : > { %1838 = vmatmul.mubr.bf16.vlgmr.msra.gmra.mrb[16].mxu0 %v1019_v52  ;;  %v1234_v52 = vrot.slane %v1202_v37, %v3003_v32 }
 0x32a   : > { %v1819_v54 = vpop.f32.mrb[4].mxu1 }
 0x32b   : > { %v1004_v55 = vadd.f32 %v1819_v54, %v1708_v38  ;;  %v995_v56 = vpop.f32.mrb[5].mxu1 }
 0x32c   : > { %v996_v58 = vadd.f32 %v1708_v38, %v995_v56  ;;  %v1820_v59 = vpop.f32.mrb[6].mxu1 }
 0x32d   : > { %v1007_v60 = vadd.f32 %v1820_v59, %v1708_v38  ;;  %v998_v61 = vpop.f32.mrb[7].mxu1  ;;  %v1016_v0 = vmax.f32 %v1004_v55, 0.0 }
 0x32e   : > { %v999_v62 = vadd.f32 %v1708_v38, %v998_v61  ;;  %v1014_v2 = vmax.f32 %v996_v58, 0.0 }
 0x32f   : > { %v1017_v1 = vmax.f32 %v1007_v60, 0.0 }
 0x330   : > { %v1015_v3 = vmax.f32 %v999_v62, 0.0 }
 0x331   : > { %v1021_v4 = vpack.c.bf16 %v1017_v1, %v1016_v0 }
 0x332   : > { %v1020_v5 = vpack.c.bf16 %v1015_v3, %v1014_v2 }
 0x334   : > { %1841 = vmatprep.mubr.bf16.mxu0 %v1020_v5 }
 0x335   : > { %1842 = vmatmul.mubr.bf16.gmra.mrb[20].mxu0 %v1021_v4 }
 0x3f8   : > { %v1839_v19 = vpop.f32.mrb[16].mxu0 }
 0x3f9   : > { %v1129_v21 = vadd.f32 %v1839_v19, %v3015_v57  ;;  %v1120_v22 = vpop.f32.mrb[17].mxu0 }
 0x3fa   : > { %v1121_v27 = vadd.f32 %v1120_v22, %v3008_v41  ;;  %v1840_v30 = vpop.f32.mrb[18].mxu0  ;;  %v1184_v41 = vrot.slane %v1168_v26, %v2999_v28 }
 0x3fb   : > { %v1245_v31 = vadd.f32 %v1214_v18, %v1129_v21  ;;  %v1132_v33 = vadd.f32 %v1840_v30, %v3018_v63  ;;  %v1123_v34 = vpop.f32.mrb[19].mxu0 }
 0x3fc   : > { %v1243_v35 = vadd.f32 %v1206_v20, %v1121_v27  ;;  %v1124_v36 = vadd.f32 %v1123_v34, %v3010_v45  ;;  %v1200_v46 = vcombine.high %v1184_v41, %v1184_v41  ;;  %v1222_v55 = vrot.slane %v1184_v41, %v3003_v32 }
 0x3fd   : > { %v1246_v38 = vadd.f32 %v1218_v24, %v1132_v33  ;;  %v3046_v57 = vadd.f32 %v1252_v25, %v1245_v31 }
 0x3fe   : > { %v3048_v42 = vadd.f32 %v1252_v25, %v1243_v35  ;;  %v1244_v43 = vadd.f32 %v1210_v39, %v1124_v36  ;;  %v1230_v49 = vrot.slane %v1200_v46, %v3003_v32 }
 0x3ff   : > { %1265 = vadd.xlane.f32.xlu1 %v3046_v57  ;;  %v3053_v63 = vadd.f32 %v1252_v25, %v1246_v38  ;;  %v1287_v45 = vmul.f32 %v3046_v57, %v3046_v57 }
 0x400   : > { %1261 = vadd.xlane.f32.xlu0 %v3048_v42  ;;  %v3061_v48 = vadd.f32 %v1252_v25, %v1244_v43  ;;  %v1285_v58 = vmul.f32 %v3048_v42, %v3048_v42 }
 0x401   : > { %v1288_v47 = vmul.f32 %v3053_v63, %v3053_v63 }
 0x402   : > { %v1286_v53 = vmul.f32 %v3061_v48, %v3061_v48 }
 0x403   : > { %1267 = vadd.xlane.f32.xlu1 %v3053_v63 }
 0x404   : > { %1297 = vadd.xlane.f32.xlu0 %v1287_v45 }
 0x407   : > { %1299 = vadd.xlane.f32.xlu1 %v1288_v47 }
 0x408   : > { %v1843_v50 = vpop.f32.mrb[20].mxu0  ;;  %1263 = vadd.xlane.f32.xlu0 %v3061_v48 }
 0x409   : > { %v1145_v28 = vadd.f32 %v1843_v50, %v3029_v23  ;;  %v1136_v51 = vpop.f32.mrb[21].mxu0  ;;  %v1226_v23 = vrot.slane %v1198_v44, %v3003_v32 }
 0x40a   : > { %v1137_v54 = vadd.f32 %v1136_v51, %v3023_v8  ;;  %v1844_v56 = vpop.f32.mrb[22].mxu0 }
 0x40b   : > { %v1249_v59 = vadd.f32 %v1230_v49, %v1145_v28  ;;  %v1148_v60 = vadd.f32 %v1844_v56, %v3031_v29  ;;  %v1139_v61 = vpop.f32.mrb[23].mxu0  ;;  %1295 = vadd.xlane.f32.xlu1 %v1286_v53 }
 0x40c   : > { %v1140_v62 = vadd.f32 %v1139_v61, %v3025_v14  ;;  %1293 = vadd.xlane.f32.xlu0 %v1285_v58  ;;  %v1247_v8 = vadd.f32 %v1222_v55, %v1137_v54  ;;  %v3105_v54 = vld [vmem:[#allocation17] ss:$0 sm:$0xff] }
 0x40d   : > { %v1250_v0 = vadd.f32 %v1234_v52, %v1148_v60  ;;  %v3076_v1 = vadd.f32 %v1252_v25, %v1249_v59 }
 0x40e   : > { %v1248_v2 = vadd.f32 %v1226_v23, %v1140_v62  ;;  %v3082_v4 = vadd.f32 %v1252_v25, %v1247_v8 }
 0x40f   : > { %v3078_v3 = vadd.f32 %v1252_v25, %v1250_v0  ;;  %v1291_v5 = vmul.f32 %v3076_v1, %v3076_v1 }
 0x410   : > { %1273 = vadd.xlane.f32.xlu0 %v3076_v1  ;;  %v3084_v29 = vadd.f32 %v1252_v25, %v1248_v2  ;;  %v1289_v32 = vmul.f32 %v3082_v4, %v3082_v4 }
 0x411   : > { %1275 = vadd.xlane.f32.xlu1 %v3078_v3  ;;  %v1292_v6 = vmul.f32 %v3078_v3, %v3078_v3 }
 0x412   : > { %v1290_v14 = vmul.f32 %v3084_v29, %v3084_v29 }
 0x414   : > { %1269 = vadd.xlane.f32.xlu0 %v3082_v4 }
 0x415   : > { %1271 = vadd.xlane.f32.xlu1 %v3084_v29 }
 0x418   : > { %1301 = vadd.xlane.f32.xlu0 %v1289_v32  ;;  %v3115_v32 = vld [vmem:[#allocation19] ss:$0 sm:$0xff] }
 0x419   : > { %1303 = vadd.xlane.f32.xlu1 %v1290_v14 }
 0x41c   : > { %1305 = vadd.xlane.f32.xlu0 %v1291_v5 }
 0x41d   : > { %1307 = vadd.xlane.f32.xlu1 %v1292_v6 }
 0x48c   : > { %v1266_v7 = vpop.xlane.xlu1 %1265 }
 0x48d   : > { %v1262_v9 = vpop.xlane.xlu0 %1261  ;;  %v1279_v10 = vmul.f32 0.03125, %v1266_v7 }
 0x48e   : > { %v3096_v22 = vmul.f32 0.03125, %v1262_v9 }
 0x48f   : > { %v1319_v15 = vmul.f32 %v1279_v10, %v1279_v10  ;;  %v1343_v51 = vsub.f32 %v3046_v57, %v1279_v10 }
 0x490   : > { %v1268_v11 = vpop.xlane.xlu1 %1267  ;;  %v1317_v36 = vmul.f32 %v3096_v22, %v3096_v22 }
 0x491   : > { %v1280_v12 = vmul.f32 0.03125, %v1268_v11  ;;  %v1298_v13 = vpop.xlane.xlu0 %1297 }
 0x492   : > { %v1311_v16 = vmul.f32 0.03125, %v1298_v13 }
 0x493   : > { %v1320_v19 = vmul.f32 %v1280_v12, %v1280_v12  ;;  %v1344_v58 = vsub.f32 %v3053_v63, %v1280_v12  ;;  %v1341_v63 = vsub.f32 %v3048_v42, %v3096_v22 }
 0x494   : > { %v1327_v17 = vsub.f32 %v1311_v16, %v1319_v15  ;;  %v1300_v18 = vpop.xlane.xlu1 %1299 }
 0x495   : > { %v1312_v20 = vmul.f32 0.03125, %v1300_v18  ;;  %v1264_v21 = vpop.xlane.xlu0 %1263 }
 0x496   : > { %v1335_v24 = vmax.f32 %v1327_v17, 0.0  ;;  %v1278_v25 = vmul.f32 0.03125, %v1264_v21 }
 0x497   : > { %v1328_v26 = vsub.f32 %v1312_v20, %v1320_v19 }
 0x498   : > { %v1351_v27 = vadd.f32 1e-05, %v1335_v24  ;;  %v1318_v30 = vmul.f32 %v1278_v25, %v1278_v25  ;;  %v1296_v31 = vpop.xlane.xlu1 %1295  ;;  %v1342_v6 = vsub.f32 %v3061_v48, %v1278_v25 }
 0x499   : > { %v1336_v33 = vmax.f32 %v1328_v26, 0.0  ;;  %v1310_v34 = vmul.f32 0.03125, %v1296_v31  ;;  %v1294_v35 = vpop.xlane.xlu0 %1293 }
 0x49a   : > { %2021 = vrsqrt.f32 %v1351_v27  ;;  %v1309_v38 = vmul.f32 0.03125, %v1294_v35 }
 0x49b   : > { %v1352_v39 = vadd.f32 1e-05, %v1336_v33  ;;  %v1326_v40 = vsub.f32 %v1310_v34, %v1318_v30 }
 0x49c   : > { %v1325_v41 = vsub.f32 %v1309_v38, %v1317_v36 }
 0x49d   : > { %2023 = vrsqrt.f32 %v1352_v39  ;;  %v1334_v43 = vmax.f32 %v1326_v40, 0.0  ;;  %v1274_v44 = vpop.xlane.xlu0 %1273 }
 0x49e   : > { %v1333_v45 = vmax.f32 %v1325_v41, 0.0  ;;  %v1276_v46 = vpop.xlane.xlu1 %1275  ;;  %v3108_v59 = vmul.f32 0.03125, %v1274_v44 }
 0x49f   : > { %v1350_v47 = vadd.f32 1e-05, %v1334_v43  ;;  %v1284_v57 = vmul.f32 0.03125, %v1276_v46 }
 0x4a0   : > { %v1349_v37 = vadd.f32 1e-05, %v1333_v45  ;;  %v1323_v11 = vmul.f32 %v3108_v59, %v3108_v59 }
 0x4a1   : > { %2025 = vrsqrt.f32 %v1350_v47  ;;  %v1270_v49 = vpop.xlane.xlu0 %1269  ;;  %v1324_v18 = vmul.f32 %v1284_v57, %v1284_v57 }
 0x4a2   : > { %2027 = vrsqrt.f32 %v1349_v37  ;;  %v3100_v50 = vmul.f32 0.03125, %v1270_v49  ;;  %v1272_v28 = vpop.xlane.xlu1 %1271  ;;  %v1347_v49 = vsub.f32 %v3076_v1, %v3108_v59 }
 0x4a3   : > { %v3103_v52 = vmul.f32 0.03125, %v1272_v28 }
 0x4a4   : > { %v2022_v53 = vpop.eup %2021  ;;  %v1321_v60 = vmul.f32 %v3100_v50, %v3100_v50  ;;  %v1345_v43 = vsub.f32 %v3082_v4, %v3100_v50 }
 0x4a5   : > { %v1367_v55 = vmul.f32 %v2022_v53, %v1343_v51  ;;  %v1302_v56 = vpop.xlane.xlu0 %1301  ;;  %v1322_v8 = vmul.f32 %v3103_v52, %v3103_v52  ;;  %v1346_v45 = vsub.f32 %v3084_v29, %v3103_v52  ;;  %v1348_v53 = vsub.f32 %v3078_v3, %v1284_v57 }
 0x4a6   : > { %v1313_v61 = vmul.f32 0.03125, %v1302_v56  ;;  %v1304_v23 = vpop.xlane.xlu1 %1303 }
 0x4a7   : > { %v2024_v62 = vpop.eup %2023  ;;  %v1382_v0 = vmul.f32 %v3105_v54, %v1367_v55  ;;  %v1314_v2 = vmul.f32 0.03125, %v1304_v23 }
 0x4a8   : > { %v1368_v14 = vmul.f32 %v2024_v62, %v1344_v58  ;;  %v1329_v5 = vsub.f32 %v1313_v61, %v1321_v60 }
 0x4a9   : > { %v1330_v7 = vsub.f32 %v1314_v2, %v1322_v8  ;;  %v1306_v9 = vpop.xlane.xlu0 %1305  ;;  %v1397_v17 = vadd.f32 %v3115_v32, %v1382_v0 }
 0x4aa   : > { %v1383_v10 = vmul.f32 %v3105_v54, %v1368_v14  ;;  %v1337_v12 = vmax.f32 %v1329_v5, 0.0  ;;  %v1315_v13 = vmul.f32 0.03125, %v1306_v9  ;;  %v1308_v15 = vpop.xlane.xlu1 %1307 }
 0x4ab   : > { %v2026_v16 = vpop.eup %2025  ;;  %v1338_v19 = vmax.f32 %v1330_v7, 0.0  ;;  %v1316_v20 = vmul.f32 0.03125, %v1308_v15 }
 0x4ac   : > { %v2028_v21 = vpop.eup %2027  ;;  %v1398_v42 = vadd.f32 %v3115_v32, %v1383_v10  ;;  %v1366_v48 = vmul.f32 %v2026_v16, %v1342_v6  ;;  %v1353_v22 = vadd.f32 1e-05, %v1337_v12  ;;  %v1331_v24 = vsub.f32 %v1315_v13, %v1323_v11 }
 0x4ad   : > { %v1365_v25 = vmul.f32 %v2028_v21, %v1341_v63  ;;  %v1354_v26 = vadd.f32 1e-05, %v1338_v19  ;;  %v1332_v27 = vsub.f32 %v1316_v20, %v1324_v18 }
 0x4ae   : > { %v1758_v30 = vpack.c.bf16 %v1398_v42, %v1397_v17  ;;  %v1381_v31 = vmul.f32 %v3105_v54, %v1366_v48  ;;  %2029 = vrsqrt.f32 %v1353_v22  ;;  %v1339_v33 = vmax.f32 %v1331_v24, 0.0 }
 0x4af   : > { %v1380_v34 = vmul.f32 %v3105_v54, %v1365_v25  ;;  %2031 = vrsqrt.f32 %v1354_v26  ;;  %v1340_v35 = vmax.f32 %v1332_v27, 0.0 }
 0x4b0   : > { %v1396_v36 = vadd.f32 %v3115_v32, %v1381_v31  ;;  %v1355_v38 = vadd.f32 1e-05, %v1339_v33  ;;  %1770 = vst [vmem:[%s3130_s24 + $0x8] sm:$0xff] %v1758_v30  }
 0x4b1   : > { %v1395_v39 = vadd.f32 %v3115_v32, %v1380_v34  ;;  %v1356_v40 = vadd.f32 1e-05, %v1340_v35 }
 0x4b2   : > { %2033 = vrsqrt.f32 %v1355_v38 }
 0x4b3   : > { %v1753_v41 = vpack.c.bf16 %v1396_v36, %v1395_v39  ;;  %2035 = vrsqrt.f32 %v1356_v40 }
 0x4b5   : > { %1754 = vst [vmem:[%s3130_s24] sm:$0xff] %v1753_v41  }
 0x4b8   : > { %v2030_v44 = vpop.eup %2029 }
 0x4b9   : > { %v2032_v46 = vpop.eup %2031  ;;  %v1369_v47 = vmul.f32 %v2030_v44, %v1345_v43 }
 0x4ba   : > { %v1370_v37 = vmul.f32 %v2032_v46, %v1346_v45 }
 0x4bb   : > { %v1384_v28 = vmul.f32 %v3105_v54, %v1369_v47 }
 0x4bc   : > { %v2034_v51 = vpop.eup %2033  ;;  %v1385_v4 = vmul.f32 %v3105_v54, %v1370_v37 }
 0x4bd   : > { %v2036_v50 = vpop.eup %2035  ;;  %v1399_v29 = vadd.f32 %v3115_v32, %v1384_v28  ;;  %v1371_v52 = vmul.f32 %v2034_v51, %v1347_v49 }
 0x4be   : > { %v1400_v55 = vadd.f32 %v3115_v32, %v1385_v4  ;;  %v1372_v56 = vmul.f32 %v2036_v50, %v1348_v53 }
 0x4bf   : > { %v1386_v1 = vmul.f32 %v3105_v54, %v1371_v52 }
 0x4c0   : > { %v1763_v58 = vpack.c.bf16 %v1400_v55, %v1399_v29  ;;  %v1387_v59 = vmul.f32 %v3105_v54, %v1372_v56 }
 0x4c1   : > { %v1401_v3 = vadd.f32 %v3115_v32, %v1386_v1 }
 0x4c2   : > { %v1402_v60 = vadd.f32 %v3115_v32, %v1387_v59  ;;  %1771 = vst [vmem:[%s3130_s24 + $0x10] sm:$0xff] %v1763_v58  }
 0x4c4   : > { %v1768_v61 = vpack.c.bf16 %v1402_v60, %v1401_v3 }
 0x4c6   : > { %1772 = vst [vmem:[%s3130_s24 + $0x18] sm:$0xff] %v1768_v61  }
 0x4c7   : > { %2368 = shalt.err (!%p2365_p2)
}
 0x4c8   : > { %s2369_s7 = scalar_lea.hbm %s3156_s30, 512  ;;  %s2373_s24 = scalar_lea.hbm %s3284_s13, 1024 }
 0x4c9   : > { %p2370_p9 = scmp.ne.s32.totalorder %s3156_s30, %s2369_s7  ;;  %p2374_p5 = scmp.lt.u32.totalorder %s3156_s30, %s3284_s13 }
 0x4ca   : > { %p2375_p8 = scmp.lt.u32.totalorder %s2373_s24, %s2369_s7  ;;  %p2377_p13 = scmp.lt.u32.totalorder %s2369_s7, %s3156_s30 }
 0x4cb   : > { %p2371_p1 = pnand %p2370_p9, %p3285_p7 }
 0x4cc   : > { %p2376_p0 = por %p2375_p8, %p2374_p5 }
 0x4cd   : > { %p2372_p10 = pneg %p2371_p1 }
 0x4ce   : > { %p2378_p6 = por %p2377_p13, %p2376_p0 }
 0x4d0   : > { %p2379_p3 = pnand %p2378_p6, %p2372_p10 }
 0x4d2   : > { %2382 = shalt.err (!%p2379_p3)
}
 0x4d3   : > { %s2485_s29 = smov 64   ;;  %s2486_s25 = smov 4  }
 0x4d4   : > { %1879 = dma.vmem_to_hbm [thread:$0]  (%p3285_p7), %s3158_s23, 512, %s3156_s30, %s1444_s20, %s2485_s29, %s2485_s29, %s2486_s25  }
 0x4d5 PF: > { %s3286_s17 = sld [smem:[#allocation30_spill]]  ;;  %s3287_s15 = sld [smem:[#allocation35_spill]] }
 0x4d6   : > { %p3289_p11 = scmp.ge.s32.totalorder %s2465_s22, 2 }
 0x4db   : > { %s1473_s11 = sand.u32 1, %s3286_s17   ;;  %p3288_p4 = scmp.ne.s32.totalorder %s3287_s15, 0 }
 0x4dc   : > { %s1474_s12 = scalar_lea.sflag [#allocation4], %s1473_s11 }
 0x4dd   : > { %p1917_p12 = pnand %p3289_p11, %p3288_p4 }
 0x4df   : > { %2440 = dma.done.wait (!%p1917_p12), %s1474_s12, 512  }
 0x4e0   : > { %2442 = vsyncadd (!%p1917_p12), %s1474_s12, 4294966784  ;;  %s36_s22 = sadd.s32 1, %s2465_s22   ;;  %s3290_s17 = smov %s2449_s18 }
 0x4e1   : > { %p33_p2 = scmp.ge.s32.totalorder %s36_s22, 4   ;;  %s3291_s18 = smov %s2453_s19 }
 0x4e2   : > { %s3292_s19 = smov %s2881_s14  ;;  %s3293_s20 = smov %s2461_s21 }
 0x4e3   : > { %s3294_s21 = smov %s3296_s5  ;;  %35 = sbr.rel (!%p33_p2) target bundleno = 19 (0x13), region = 169 }
 0x4ea   :  { %1479 = vsyncpa [#allocation3], 1 }
 0x4eb   :  { %1481 = vsyncpa [#allocation3 + $0x1], 1 }
 0x4ec   :  { %1482 = vsyncpa [#allocation6], 1 }
 0x4ed   :  { %1484 = vsyncpa [#allocation6 + $0x1], 1 }
 0x4ee   :  { %1485 = vsyncpa [#allocation9], 1 }
 0x4ef   :  { %1487 = vsyncpa [#allocation9 + $0x1], 1 }
 0x4f0   :  { %1488 = vsyncpa [#allocation12], 1 }
 0x4f1   :  { %1489 = vsyncpa [#allocation15], 1 }
 0x4f2   :  { %1490 = vsyncpa [#allocation18], 1 }
 0x4f3   :  { %1491 = vsyncpa [#allocation4], 1 }
 0x4f4   :  { %1493 = vsyncpa [#allocation4 + $0x1], 1 }

</bundles_post_ra>
